<compile_context>
chip_gen: v7x
topology: tpu7x:2x2x1
jax: 0.10.0
libtpu: 0.0.40
codegen_flags: <defaults>
</compile_context>

<pallas_src>
import jax
import jax.numpy as jnp
from jax.experimental import pallas as pl
from jax.experimental.pallas import tpu as pltpu


# ----------------------------- in-kernel helpers -----------------------------

def _ln(x, g, b, eps=1e-5):
    """LayerNorm over the last dim (matches torch.nn.LayerNorm, eps=1e-5)."""
    mu = jnp.mean(x, axis=-1, keepdims=True)
    xc = x - mu
    var = jnp.mean(xc * xc, axis=-1, keepdims=True)
    return xc * jax.lax.rsqrt(var + eps) * g + b


# ----------------------------- fused Pallas kernels -----------------------------

def _embed_pallas(patches, pk):
    """conv1-as-matmul + CLS token + positional embedding + ln_pre. Grid over batch."""
    B, N, CPP = patches.shape
    width = pk["ln_pre_g"].shape[-1]
    S = N + 1

    def kernel(x_ref, w_ref, cls_ref, pc_ref, pp_ref, g_ref, b_ref, o_ref):
        pe = jnp.dot(x_ref[...].astype(jnp.bfloat16), w_ref[...],
                     preferred_element_type=jnp.float32)            # (N, width)
        g = g_ref[...]
        b = b_ref[...]
        o_ref[0:1, :] = _ln(cls_ref[...] + pc_ref[...], g, b)        # CLS row
        o_ref[1:S, :] = _ln(pe + pp_ref[...], g, b)                  # patch rows

    return pl.pallas_call(
        kernel,
        out_shape=jax.ShapeDtypeStruct((B, S, width), jnp.float32),
        grid=(B,),
        in_specs=[
            pl.BlockSpec((None, N, CPP), lambda bi: (bi, 0, 0)),
            pl.BlockSpec((CPP, width), lambda bi: (0, 0)),
            pl.BlockSpec((1, width), lambda bi: (0, 0)),
            pl.BlockSpec((1, width), lambda bi: (0, 0)),
            pl.BlockSpec((N, width), lambda bi: (0, 0)),
            pl.BlockSpec((1, width), lambda bi: (0, 0)),
            pl.BlockSpec((1, width), lambda bi: (0, 0)),
        ],
        out_specs=pl.BlockSpec((None, S, width), lambda bi: (bi, 0, 0)),
        compiler_params=pltpu.CompilerParams(dimension_semantics=("parallel",)),
    )(patches, pk["patch_w"], pk["class_embedding"], pk["pos_cls"], pk["pos_patch"],
      pk["ln_pre_g"], pk["ln_pre_b"])


def _attn_block_pallas(x, L, heads):
    """x + out_proj(MHA(ln_1(x))) — one grid step per batch element, all heads inside."""
    B, S, width = x.shape
    Dh = width // heads
    scale = Dh ** -0.5
    bf16 = jnp.bfloat16

    def kernel(x_ref, g_ref, b_ref, wqkv_ref, bqkv_ref, wo_ref, bo_ref, o_ref):
        xb = x_ref[...]                                              # (S, width) f32
        y = _ln(xb, g_ref[...], b_ref[...]).astype(bf16)
        out = jnp.zeros((S, width), jnp.float32)
        for h in range(heads):                                       # static unroll
            q = jnp.dot(y, wqkv_ref[h], preferred_element_type=jnp.float32) + bqkv_ref[h]
            k = jnp.dot(y, wqkv_ref[heads + h],
                        preferred_element_type=jnp.float32) + bqkv_ref[heads + h]
            v = jnp.dot(y, wqkv_ref[2 * heads + h],
                        preferred_element_type=jnp.float32) + bqkv_ref[2 * heads + h]
            s = jax.lax.dot_general(q.astype(bf16), k.astype(bf16),
                                    (((1,), (1,)), ((), ())),
                                    preferred_element_type=jnp.float32) * scale
            s = s - jnp.max(s, axis=-1, keepdims=True)
            p = jnp.exp(s)
            p = p * pl.reciprocal(jnp.sum(p, axis=-1, keepdims=True), approx=True)
            o_h = jnp.dot(p.astype(bf16), v.astype(bf16),
                          preferred_element_type=jnp.float32)        # (S, Dh)
            # out_proj applied per head slice of the (pre-transposed) weight
            out = out + jnp.dot(o_h.astype(bf16), wo_ref[h],
                                preferred_element_type=jnp.float32)  # (S, width)
        o_ref[...] = xb + out + bo_ref[...]                          # residual + bias

    return pl.pallas_call(
        kernel,
        out_shape=jax.ShapeDtypeStruct((B, S, width), jnp.float32),
        grid=(B,),
        in_specs=[
            pl.BlockSpec((None, S, width), lambda bi: (bi, 0, 0)),
            pl.BlockSpec((1, width), lambda bi: (0, 0)),
            pl.BlockSpec((1, width), lambda bi: (0, 0)),
            pl.BlockSpec((3 * heads, width, Dh), lambda bi: (0, 0, 0)),
            pl.BlockSpec((3 * heads, 1, Dh), lambda bi: (0, 0, 0)),
            pl.BlockSpec((heads, Dh, width), lambda bi: (0, 0, 0)),
            pl.BlockSpec((1, width), lambda bi: (0, 0)),
        ],
        out_specs=pl.BlockSpec((None, S, width), lambda bi: (bi, 0, 0)),
        compiler_params=pltpu.CompilerParams(dimension_semantics=("parallel",)),
    )(x, L["ln1_g"], L["ln1_b"], L["wqkv"], L["bqkv"], L["wo"], L["bo"])


def _mlp_block_pallas(x, L):
    """x + proj(QuickGELU(fc(ln_2(x)))) — one grid step per batch element."""
    B, S, width = x.shape
    hidden = L["fc_b"].shape[-1]
    bf16 = jnp.bfloat16

    def kernel(x_ref, g_ref, b_ref, w1_ref, b1_ref, w2_ref, b2_ref, o_ref):
        xb = x_ref[...]
        y = _ln(xb, g_ref[...], b_ref[...]).astype(bf16)
        h1 = jnp.dot(y, w1_ref[...], preferred_element_type=jnp.float32) + b1_ref[...]
        h1 = h1 * jax.nn.sigmoid(1.702 * h1)                         # QuickGELU
        h2 = jnp.dot(h1.astype(bf16), w2_ref[...],
                     preferred_element_type=jnp.float32) + b2_ref[...]
        o_ref[...] = xb + h2

    return pl.pallas_call(
        kernel,
        out_shape=jax.ShapeDtypeStruct((B, S, width), jnp.float32),
        grid=(B,),
        in_specs=[
            pl.BlockSpec((None, S, width), lambda bi: (bi, 0, 0)),
            pl.BlockSpec((1, width), lambda bi: (0, 0)),
            pl.BlockSpec((1, width), lambda bi: (0, 0)),
            pl.BlockSpec((width, hidden), lambda bi: (0, 0)),
            pl.BlockSpec((1, hidden), lambda bi: (0, 0)),
            pl.BlockSpec((hidden, width), lambda bi: (0, 0)),
            pl.BlockSpec((1, width), lambda bi: (0, 0)),
        ],
        out_specs=pl.BlockSpec((None, S, width), lambda bi: (bi, 0, 0)),
        compiler_params=pltpu.CompilerParams(dimension_semantics=("parallel",)),
    )(x, L["ln2_g"], L["ln2_b"], L["fc_w"], L["fc_b"], L["proj_w"], L["proj_b"])


def _head_pallas(cls_tok, pk):
    """ln_post + visual projection + cls_head, fused into one tiny kernel."""
    B, width = cls_tok.shape
    embed_dim = pk["vis_proj"].shape[-1]
    n_class = pk["cls_b"].shape[-1]
    bf16 = jnp.bfloat16

    def kernel(x_ref, g_ref, b_ref, wp_ref, wc_ref, bc_ref, o_ref):
        y = _ln(x_ref[...], g_ref[...], b_ref[...]).astype(bf16)
        feat = jnp.dot(y, wp_ref[...], preferred_element_type=jnp.float32)
        o_ref[...] = jnp.dot(feat.astype(bf16), wc_ref[...],
                             preferred_element_type=jnp.float32) + bc_ref[...]

    return pl.pallas_call(
        kernel,
        out_shape=jax.ShapeDtypeStruct((B, n_class), jnp.float32),
        grid=(1,),
        in_specs=[
            pl.BlockSpec((B, width), lambda i: (0, 0)),
            pl.BlockSpec((1, width), lambda i: (0, 0)),
            pl.BlockSpec((1, width), lambda i: (0, 0)),
            pl.BlockSpec((width, embed_dim), lambda i: (0, 0)),
            pl.BlockSpec((embed_dim, n_class), lambda i: (0, 0)),
            pl.BlockSpec((1, n_class), lambda i: (0, 0)),
        ],
        out_specs=pl.BlockSpec((B, n_class), lambda i: (0, 0)),
    )(cls_tok, pk["ln_post_g"], pk["ln_post_b"], pk["vis_proj"], pk["cls_w"], pk["cls_b"])


# ----------------------------- Model forward -----------------------------

def clip_image_encoder_forward(packed, image, *, heads, patch):
    """ClipImageEncoder.forward: CLIP VisionTransformer + cls_head (fused Pallas kernels)."""
    B, C, H, W = image.shape
    Gy, Gx = H // patch, W // patch
    N = Gy * Gx

    # conv1 with kernel == stride == patch, expressed as patch extraction (pure layout glue)
    x = image.astype(jnp.float32).reshape(B, C, Gy, patch, Gx, patch)
    x = x.transpose(0, 2, 4, 1, 3, 5).reshape(B, N, C * patch * patch)

    x = _embed_pallas(x, packed)                       # (B, S, width) = ln_pre(cat + pos)

    for L in packed["layers"]:
        x = _attn_block_pallas(x, L, heads)            # x + attn(ln_1(x))
        x = _mlp_block_pallas(x, L)                    # x + mlp(ln_2(x))

    return _head_pallas(x[:, 0, :], packed)            # cls_head(ln_post(x[:,0]) @ proj)


# ----------------------------- Parameters -----------------------------

def init_params(key, *, width=32, layers=2, heads=4, patch=4, resolution=16,
                in_chans=3, embed_dim=16, n_class=10):
    """PyTorch-layout parameters (same layout as the original CLIP state dict)."""
    n_patches = (resolution // patch) ** 2
    ks = jax.random.split(key, 8 + layers)

    def normal(k, shape, scale=0.02):
        return (scale * jax.random.normal(k, shape)).astype(jnp.float32)

    params = dict(width=width, heads=heads, patch=patch, embed_dim=embed_dim)
    params["conv1_w"] = normal(ks[0], (width, in_chans, patch, patch))
    params["class_embedding"] = normal(ks[1], (width,))
    params["positional_embedding"] = normal(ks[2], (n_patches + 1, width))
    params["ln_pre_g"] = jnp.ones((width,), jnp.float32)
    params["ln_pre_b"] = jnp.zeros((width,), jnp.float32)

    layer_list = []
    for i in range(layers):
        lk = jax.random.split(ks[3 + i], 4)
        layer_list.append(dict(
            ln1_g=jnp.ones((width,), jnp.float32),
            ln1_b=jnp.zeros((width,), jnp.float32),
            in_proj_w=normal(lk[0], (3 * width, width)),
            in_proj_b=jnp.zeros((3 * width,), jnp.float32),
            out_proj_w=normal(lk[1], (width, width)),
            out_proj_b=jnp.zeros((width,), jnp.float32),
            ln2_g=jnp.ones((width,), jnp.float32),
            ln2_b=jnp.zeros((width,), jnp.float32),
            fc_w=normal(lk[2], (4 * width, width)),
            fc_b=jnp.zeros((4 * width,), jnp.float32),
            proj_w=normal(lk[3], (width, 4 * width)),
            proj_b=jnp.zeros((width,), jnp.float32),
        ))
    params["layers"] = layer_list

    params["ln_post_g"] = jnp.ones((width,), jnp.float32)
    params["ln_post_b"] = jnp.zeros((width,), jnp.float32)
    params["proj"] = normal(ks[3 + layers], (width, embed_dim))
    params["cls_w"] = normal(ks[4 + layers], (n_class, embed_dim))
    params["cls_b"] = jnp.zeros((n_class,), jnp.float32)
    return params


def pack_params(p):
    """One-time repack (at load time): pre-transpose weights, per-head QKV/out layout,
    split positional embedding, cast matmul weights to bf16. Zero cost in the forward."""
    width, heads = p["width"], p["heads"]
    Dh = width // heads
    bf16 = jnp.bfloat16

    packed = dict(
        patch_w=p["conv1_w"].reshape(width, -1).T.astype(bf16),          # (C*p*p, width)
        class_embedding=p["class_embedding"][None, :],                   # (1, width)
        pos_cls=p["positional_embedding"][:1],                           # (1, width)
        pos_patch=p["positional_embedding"][1:],                         # (N, width)
        ln_pre_g=p["ln_pre_g"][None], ln_pre_b=p["ln_pre_b"][None],
        ln_post_g=p["ln_post_g"][None], ln_post_b=p["ln_post_b"][None],
        vis_proj=p["proj"].astype(bf16),                                 # (width, embed)
        cls_w=p["cls_w"].T.astype(bf16),                                 # (embed, n_class)
        cls_b=p["cls_b"][None],
    )

    layers = []
    for L in p["layers"]:
        # in_proj (3*width, width) -> per-head (3*heads, width, Dh) so the kernel does
        # q_h = y @ wqkv[h], k_h = y @ wqkv[heads+h], v_h = y @ wqkv[2*heads+h]
        wqkv = L["in_proj_w"].reshape(3, heads, Dh, width).transpose(0, 1, 3, 2)
        wqkv = wqkv.reshape(3 * heads, width, Dh).astype(bf16)
        bqkv = L["in_proj_b"].reshape(3 * heads, 1, Dh)
        # out_proj (width, width) -> per-head (heads, Dh, width): out = sum_h o_h @ wo[h]
        wo = L["out_proj_w"].T.reshape(heads, Dh, width).astype(bf16)
        layers.append(dict(
            ln1_g=L["ln1_g"][None], ln1_b=L["ln1_b"][None],
            wqkv=wqkv, bqkv=bqkv, wo=wo, bo=L["out_proj_b"][None],
            ln2_g=L["ln2_g"][None], ln2_b=L["ln2_b"][None],
            fc_w=L["fc_w"].T.astype(bf16), fc_b=L["fc_b"][None],
            proj_w=L["proj_w"].T.astype(bf16), proj_b=L["proj_b"][None],
        ))
    packed["layers"] = layers
    return packed


# ----------------------------------- main -----------------------------------

if __name__ == "__main__":
    key = jax.random.PRNGKey(0)
    pkey, ikey = jax.random.split(key)

    # Small synthetic config: width=32, 2 layers, 4 heads, patch=4, res=16 -> S=17,
    # embed_dim=16, n_class=10, batch=2.
    torch_params = init_params(pkey)
    packed = pack_params(torch_params)
    image = jax.random.normal(ikey, (2, 3, 16, 16), dtype=jnp.float32)

    fwd = jax.jit(clip_image_encoder_forward, static_argnames=("heads", "patch"))
    logits = fwd(packed, image, heads=torch_params["heads"], patch=torch_params["patch"])
    logits = jax.block_until_ready(logits)

    assert logits.shape == (2, 10), logits.shape
    assert bool(jnp.all(jnp.isfinite(logits)))
    print("KERNEL_OK")
</pallas_src>

<mosaic_0001>
module attributes {stable_mosaic.version = 11 : i64} {
  func.func @kernel(%arg0: i32, %arg1: memref<1x16x48xf32, #tpu.memory_space<vmem>>, %arg2: memref<48x32xbf16, #tpu.memory_space<vmem>>, %arg3: memref<1x32xf32, #tpu.memory_space<vmem>>, %arg4: memref<1x32xf32, #tpu.memory_space<vmem>>, %arg5: memref<16x32xf32, #tpu.memory_space<vmem>>, %arg6: memref<1x32xf32, #tpu.memory_space<vmem>>, %arg7: memref<1x32xf32, #tpu.memory_space<vmem>>, %arg8: memref<1x17x32xf32, #tpu.memory_space<vmem>>) attributes {dimension_semantics = [#tpu.dimension_semantics<parallel>], iteration_bounds = array<i64: 2>, scalar_prefetch = 0 : i64, scratch_operands = 0 : i64, tpu.core_type = #tpu.core_type<tc>, window_params = [{transform_indices = @transform_0, window_bounds = array<i64: 1, 16, 48>}, {pipeline_mode = #tpu.pipeline_mode<synchronous>, transform_indices = @transform_1, window_bounds = array<i64: 48, 32>}, {pipeline_mode = #tpu.pipeline_mode<synchronous>, transform_indices = @transform_2, window_bounds = array<i64: 1, 32>}, {pipeline_mode = #tpu.pipeline_mode<synchronous>, transform_indices = @transform_3, window_bounds = array<i64: 1, 32>}, {pipeline_mode = #tpu.pipeline_mode<synchronous>, transform_indices = @transform_4, window_bounds = array<i64: 16, 32>}, {pipeline_mode = #tpu.pipeline_mode<synchronous>, transform_indices = @transform_5, window_bounds = array<i64: 1, 32>}, {pipeline_mode = #tpu.pipeline_mode<synchronous>, transform_indices = @transform_6, window_bounds = array<i64: 1, 32>}, {transform_indices = @transform_7, window_bounds = array<i64: 1, 17, 32>}]} {
    %c0 = arith.constant 0 : index
    %c0_0 = arith.constant 0 : index
    %c0_1 = arith.constant 0 : index
    %0 = vector.load %arg1[%c0, %c0_0, %c0_1] : memref<1x16x48xf32, #tpu.memory_space<vmem>>, vector<1x16x48xf32>
    %1 = vector.shape_cast %0 : vector<1x16x48xf32> to vector<16x48xf32>
    %2 = arith.truncf %1 : vector<16x48xf32> to vector<16x48xbf16>
    %c0_2 = arith.constant 0 : index
    %c0_3 = arith.constant 0 : index
    %3 = vector.load %arg2[%c0_2, %c0_3] : memref<48x32xbf16, #tpu.memory_space<vmem>>, vector<48x32xbf16>
    %cst = arith.constant dense<0.000000e+00> : vector<16x32xf32>
    %4 = tpu.matmul %2, %3, %cst {dimension_numbers = #tpu.dot_dimension_numbers<[1], [0], [0], [1], [0, 0, 1, 1], [], []>} : vector<16x48xbf16>, vector<48x32xbf16>, vector<16x32xf32> -> vector<16x32xf32>
    %c0_4 = arith.constant 0 : index
    %c0_5 = arith.constant 0 : index
    %5 = vector.load %arg6[%c0_4, %c0_5] : memref<1x32xf32, #tpu.memory_space<vmem>>, vector<1x32xf32>
    %c0_6 = arith.constant 0 : index
    %c0_7 = arith.constant 0 : index
    %6 = vector.load %arg7[%c0_6, %c0_7] : memref<1x32xf32, #tpu.memory_space<vmem>>, vector<1x32xf32>
    %c0_8 = arith.constant 0 : index
    %c0_9 = arith.constant 0 : index
    %7 = vector.load %arg3[%c0_8, %c0_9] : memref<1x32xf32, #tpu.memory_space<vmem>>, vector<1x32xf32>
    %c0_10 = arith.constant 0 : index
    %c0_11 = arith.constant 0 : index
    %8 = vector.load %arg4[%c0_10, %c0_11] : memref<1x32xf32, #tpu.memory_space<vmem>>, vector<1x32xf32>
    %9 = arith.addf %7, %8 : vector<1x32xf32>
    %cst_12 = arith.constant dense<0.000000e+00> : vector<1xf32>
    %10 = vector.multi_reduction <add>, %9, %cst_12 [1] : vector<1x32xf32> to vector<1xf32>
    %11 = vector.shape_cast %10 : vector<1xf32> to vector<1x1xf32>
    %cst_13 = arith.constant 3.200000e+01 : f32
    %12 = vector.broadcast %cst_13 : f32 to vector<1x1xf32>
    %13 = arith.divf %11, %12 : vector<1x1xf32>
    %14 = vector.broadcast %13 : vector<1x1xf32> to vector<1x32xf32>
    %15 = arith.subf %9, %14 : vector<1x32xf32>
    %16 = arith.mulf %15, %15 : vector<1x32xf32>
    %cst_14 = arith.constant dense<0.000000e+00> : vector<1xf32>
    %17 = vector.multi_reduction <add>, %16, %cst_14 [1] : vector<1x32xf32> to vector<1xf32>
    %18 = vector.shape_cast %17 : vector<1xf32> to vector<1x1xf32>
    %cst_15 = arith.constant 3.200000e+01 : f32
    %19 = vector.broadcast %cst_15 : f32 to vector<1x1xf32>
    %20 = arith.divf %18, %19 : vector<1x1xf32>
    %cst_16 = arith.constant 9.99999974E-6 : f32
    %21 = vector.broadcast %cst_16 : f32 to vector<1x1xf32>
    %22 = arith.addf %20, %21 : vector<1x1xf32>
    %23 = math.rsqrt %22 : vector<1x1xf32>
    %24 = vector.broadcast %23 : vector<1x1xf32> to vector<1x32xf32>
    %25 = arith.mulf %15, %24 : vector<1x32xf32>
    %26 = arith.mulf %25, %5 : vector<1x32xf32>
    %27 = arith.addf %26, %6 : vector<1x32xf32>
    %c0_17 = arith.constant 0 : index
    %c0_18 = arith.constant 0 : index
    %c0_19 = arith.constant 0 : index
    %28 = vector.load %arg8[%c0_17, %c0_18, %c0_19] : memref<1x17x32xf32, #tpu.memory_space<vmem>>, vector<1x1x32xf32>
    %29 = vector.shape_cast %28 : vector<1x1x32xf32> to vector<1x32xf32>
    %30 = vector.shape_cast %27 : vector<1x32xf32> to vector<1x1x32xf32>
    tpu.vector_store %arg8[%c0_17, %c0_18, %c0_19], %30 {strides = array<i32>} : memref<1x17x32xf32, #tpu.memory_space<vmem>>, vector<1x1x32xf32>,
    %c0_20 = arith.constant 0 : index
    %c0_21 = arith.constant 0 : index
    %31 = vector.load %arg5[%c0_20, %c0_21] : memref<16x32xf32, #tpu.memory_space<vmem>>, vector<16x32xf32>
    %32 = arith.addf %4, %31 : vector<16x32xf32>
    %cst_22 = arith.constant dense<0.000000e+00> : vector<16xf32>
    %33 = vector.multi_reduction <add>, %32, %cst_22 [1] : vector<16x32xf32> to vector<16xf32>
    %34 = vector.shape_cast %33 : vector<16xf32> to vector<16x1xf32>
    %cst_23 = arith.constant 3.200000e+01 : f32
    %35 = vector.broadcast %cst_23 : f32 to vector<16x1xf32>
    %36 = arith.divf %34, %35 : vector<16x1xf32>
    %37 = vector.broadcast %36 : vector<16x1xf32> to vector<16x32xf32>
    %38 = arith.subf %32, %37 : vector<16x32xf32>
    %39 = arith.mulf %38, %38 : vector<16x32xf32>
    %cst_24 = arith.constant dense<0.000000e+00> : vector<16xf32>
    %40 = vector.multi_reduction <add>, %39, %cst_24 [1] : vector<16x32xf32> to vector<16xf32>
    %41 = vector.shape_cast %40 : vector<16xf32> to vector<16x1xf32>
    %cst_25 = arith.constant 3.200000e+01 : f32
    %42 = vector.broadcast %cst_25 : f32 to vector<16x1xf32>
    %43 = arith.divf %41, %42 : vector<16x1xf32>
    %cst_26 = arith.constant 9.99999974E-6 : f32
    %44 = vector.broadcast %cst_26 : f32 to vector<16x1xf32>
    %45 = arith.addf %43, %44 : vector<16x1xf32>
    %46 = math.rsqrt %45 : vector<16x1xf32>
    %47 = vector.broadcast %46 : vector<16x1xf32> to vector<16x32xf32>
    %48 = arith.mulf %38, %47 : vector<16x32xf32>
    %49 = vector.broadcast %5 : vector<1x32xf32> to vector<16x32xf32>
    %50 = arith.mulf %48, %49 : vector<16x32xf32>
    %51 = vector.broadcast %6 : vector<1x32xf32> to vector<16x32xf32>
    %52 = arith.addf %50, %51 : vector<16x32xf32>
    %c0_27 = arith.constant 0 : index
    %c1 = arith.constant 1 : index
    %c0_28 = arith.constant 0 : index
    %53 = vector.load %arg8[%c0_27, %c1, %c0_28] : memref<1x17x32xf32, #tpu.memory_space<vmem>>, vector<1x16x32xf32>
    %54 = vector.shape_cast %53 : vector<1x16x32xf32> to vector<16x32xf32>
    %55 = vector.shape_cast %52 : vector<16x32xf32> to vector<1x16x32xf32>
    tpu.vector_store %arg8[%c0_27, %c1, %c0_28], %55 {strides = array<i32>} : memref<1x17x32xf32, #tpu.memory_space<vmem>>, vector<1x16x32xf32>,
    return
  }
  func.func @transform_0(%arg0: i32) -> (i32, i32, i32) {
    %c0_i32 = arith.constant 0 : i32
    %c0_i32_0 = arith.constant 0 : i32
    %c0_i32_1 = arith.constant 0 : i32
    return %arg0, %c0_i32, %c0_i32_0 : i32, i32, i32
  }
  func.func @transform_1(%arg0: i32) -> (i32, i32) {
    %c0_i32 = arith.constant 0 : i32
    %c0_i32_0 = arith.constant 0 : i32
    %c0_i32_1 = arith.constant 0 : i32
    return %c0_i32, %c0_i32_0 : i32, i32
  }
  func.func @transform_2(%arg0: i32) -> (i32, i32) {
    %c0_i32 = arith.constant 0 : i32
    %c0_i32_0 = arith.constant 0 : i32
    %c0_i32_1 = arith.constant 0 : i32
    return %c0_i32, %c0_i32_0 : i32, i32
  }
  func.func @transform_3(%arg0: i32) -> (i32, i32) {
    %c0_i32 = arith.constant 0 : i32
    %c0_i32_0 = arith.constant 0 : i32
    %c0_i32_1 = arith.constant 0 : i32
    return %c0_i32, %c0_i32_0 : i32, i32
  }
  func.func @transform_4(%arg0: i32) -> (i32, i32) {
    %c0_i32 = arith.constant 0 : i32
    %c0_i32_0 = arith.constant 0 : i32
    %c0_i32_1 = arith.constant 0 : i32
    return %c0_i32, %c0_i32_0 : i32, i32
  }
  func.func @transform_5(%arg0: i32) -> (i32, i32) {
    %c0_i32 = arith.constant 0 : i32
    %c0_i32_0 = arith.constant 0 : i32
    %c0_i32_1 = arith.constant 0 : i32
    return %c0_i32, %c0_i32_0 : i32, i32
  }
  func.func @transform_6(%arg0: i32) -> (i32, i32) {
    %c0_i32 = arith.constant 0 : i32
    %c0_i32_0 = arith.constant 0 : i32
    %c0_i32_1 = arith.constant 0 : i32
    return %c0_i32, %c0_i32_0 : i32, i32
  }
  func.func @transform_7(%arg0: i32) -> (i32, i32, i32) {
    %c0_i32 = arith.constant 0 : i32
    %c0_i32_0 = arith.constant 0 : i32
    %c0_i32_1 = arith.constant 0 : i32
    return %arg0, %c0_i32, %c0_i32_0 : i32, i32, i32
  }
}

module attributes {stable_mosaic.version = 11 : i64} {
  func.func @kernel(%arg0: i32, %arg1: memref<1x17x32xf32, #tpu.memory_space<vmem>>, %arg2: memref<1x32xf32, #tpu.memory_space<vmem>>, %arg3: memref<1x32xf32, #tpu.memory_space<vmem>>, %arg4: memref<12x32x8xbf16, #tpu.memory_space<vmem>>, %arg5: memref<12x1x8xf32, #tpu.memory_space<vmem>>, %arg6: memref<4x8x32xbf16, #tpu.memory_space<vmem>>, %arg7: memref<1x32xf32, #tpu.memory_space<vmem>>, %arg8: memref<1x17x32xf32, #tpu.memory_space<vmem>>) attributes {dimension_semantics = [#tpu.dimension_semantics<parallel>], iteration_bounds = array<i64: 2>, scalar_prefetch = 0 : i64, scratch_operands = 0 : i64, tpu.core_type = #tpu.core_type<tc>, window_params = [{transform_indices = @transform_0, window_bounds = array<i64: 1, 17, 32>}, {pipeline_mode = #tpu.pipeline_mode<synchronous>, transform_indices = @transform_1, window_bounds = array<i64: 1, 32>}, {pipeline_mode = #tpu.pipeline_mode<synchronous>, transform_indices = @transform_2, window_bounds = array<i64: 1, 32>}, {pipeline_mode = #tpu.pipeline_mode<synchronous>, transform_indices = @transform_3, window_bounds = array<i64: 12, 32, 8>}, {pipeline_mode = #tpu.pipeline_mode<synchronous>, transform_indices = @transform_4, window_bounds = array<i64: 12, 1, 8>}, {pipeline_mode = #tpu.pipeline_mode<synchronous>, transform_indices = @transform_5, window_bounds = array<i64: 4, 8, 32>}, {pipeline_mode = #tpu.pipeline_mode<synchronous>, transform_indices = @transform_6, window_bounds = array<i64: 1, 32>}, {transform_indices = @transform_7, window_bounds = array<i64: 1, 17, 32>}]} {
    %c0 = arith.constant 0 : index
    %c0_0 = arith.constant 0 : index
    %c0_1 = arith.constant 0 : index
    %0 = vector.load %arg1[%c0, %c0_0, %c0_1] : memref<1x17x32xf32, #tpu.memory_space<vmem>>, vector<1x17x32xf32>
    %1 = vector.shape_cast %0 : vector<1x17x32xf32> to vector<17x32xf32>
    %c0_2 = arith.constant 0 : index
    %c0_3 = arith.constant 0 : index
    %2 = vector.load %arg2[%c0_2, %c0_3] : memref<1x32xf32, #tpu.memory_space<vmem>>, vector<1x32xf32>
    %c0_4 = arith.constant 0 : index
    %c0_5 = arith.constant 0 : index
    %3 = vector.load %arg3[%c0_4, %c0_5] : memref<1x32xf32, #tpu.memory_space<vmem>>, vector<1x32xf32>
    %cst = arith.constant dense<0.000000e+00> : vector<17xf32>
    %4 = vector.multi_reduction <add>, %1, %cst [1] : vector<17x32xf32> to vector<17xf32>
    %5 = vector.shape_cast %4 : vector<17xf32> to vector<17x1xf32>
    %cst_6 = arith.constant 3.200000e+01 : f32
    %6 = vector.broadcast %cst_6 : f32 to vector<17x1xf32>
    %7 = arith.divf %5, %6 : vector<17x1xf32>
    %8 = vector.broadcast %7 : vector<17x1xf32> to vector<17x32xf32>
    %9 = arith.subf %1, %8 : vector<17x32xf32>
    %10 = arith.mulf %9, %9 : vector<17x32xf32>
    %cst_7 = arith.constant dense<0.000000e+00> : vector<17xf32>
    %11 = vector.multi_reduction <add>, %10, %cst_7 [1] : vector<17x32xf32> to vector<17xf32>
    %12 = vector.shape_cast %11 : vector<17xf32> to vector<17x1xf32>
    %cst_8 = arith.constant 3.200000e+01 : f32
    %13 = vector.broadcast %cst_8 : f32 to vector<17x1xf32>
    %14 = arith.divf %12, %13 : vector<17x1xf32>
    %cst_9 = arith.constant 9.99999974E-6 : f32
    %15 = vector.broadcast %cst_9 : f32 to vector<17x1xf32>
    %16 = arith.addf %14, %15 : vector<17x1xf32>
    %17 = math.rsqrt %16 : vector<17x1xf32>
    %18 = vector.broadcast %17 : vector<17x1xf32> to vector<17x32xf32>
    %19 = arith.mulf %9, %18 : vector<17x32xf32>
    %20 = vector.broadcast %2 : vector<1x32xf32> to vector<17x32xf32>
    %21 = arith.mulf %19, %20 : vector<17x32xf32>
    %22 = vector.broadcast %3 : vector<1x32xf32> to vector<17x32xf32>
    %23 = arith.addf %21, %22 : vector<17x32xf32>
    %24 = arith.truncf %23 : vector<17x32xf32> to vector<17x32xbf16>
    %cst_10 = arith.constant 0.000000e+00 : f32
    %25 = vector.broadcast %cst_10 : f32 to vector<17x32xf32>
    %c0_11 = arith.constant 0 : index
    %c0_12 = arith.constant 0 : index
    %c0_13 = arith.constant 0 : index
    %26 = vector.load %arg4[%c0_11, %c0_12, %c0_13] : memref<12x32x8xbf16, #tpu.memory_space<vmem>>, vector<1x32x8xbf16>
    %27 = vector.shape_cast %26 : vector<1x32x8xbf16> to vector<32x8xbf16>
    %cst_14 = arith.constant dense<0.000000e+00> : vector<17x8xf32>
    %28 = tpu.matmul %24, %27, %cst_14 {dimension_numbers = #tpu.dot_dimension_numbers<[1], [0], [0], [1], [0, 0, 1, 1], [], []>} : vector<17x32xbf16>, vector<32x8xbf16>, vector<17x8xf32> -> vector<17x8xf32>
    %c0_15 = arith.constant 0 : index
    %c0_16 = arith.constant 0 : index
    %c0_17 = arith.constant 0 : index
    %29 = vector.load %arg5[%c0_15, %c0_16, %c0_17] : memref<12x1x8xf32, #tpu.memory_space<vmem>>, vector<1x1x8xf32>
    %30 = vector.shape_cast %29 : vector<1x1x8xf32> to vector<1x8xf32>
    %31 = vector.broadcast %30 : vector<1x8xf32> to vector<17x8xf32>
    %32 = arith.addf %28, %31 : vector<17x8xf32>
    %c4 = arith.constant 4 : index
    %c0_18 = arith.constant 0 : index
    %c0_19 = arith.constant 0 : index
    %33 = vector.load %arg4[%c4, %c0_18, %c0_19] : memref<12x32x8xbf16, #tpu.memory_space<vmem>>, vector<1x32x8xbf16>
    %34 = vector.shape_cast %33 : vector<1x32x8xbf16> to vector<32x8xbf16>
    %cst_20 = arith.constant dense<0.000000e+00> : vector<17x8xf32>
    %35 = tpu.matmul %24, %34, %cst_20 {dimension_numbers = #tpu.dot_dimension_numbers<[1], [0], [0], [1], [0, 0, 1, 1], [], []>} : vector<17x32xbf16>, vector<32x8xbf16>, vector<17x8xf32> -> vector<17x8xf32>
    %c4_21 = arith.constant 4 : index
    %c0_22 = arith.constant 0 : index
    %c0_23 = arith.constant 0 : index
    %36 = vector.load %arg5[%c4_21, %c0_22, %c0_23] : memref<12x1x8xf32, #tpu.memory_space<vmem>>, vector<1x1x8xf32>
    %37 = vector.shape_cast %36 : vector<1x1x8xf32> to vector<1x8xf32>
    %38 = vector.broadcast %37 : vector<1x8xf32> to vector<17x8xf32>
    %39 = arith.addf %35, %38 : vector<17x8xf32>
    %c8 = arith.constant 8 : index
    %c0_24 = arith.constant 0 : index
    %c0_25 = arith.constant 0 : index
    %40 = vector.load %arg4[%c8, %c0_24, %c0_25] : memref<12x32x8xbf16, #tpu.memory_space<vmem>>, vector<1x32x8xbf16>
    %41 = vector.shape_cast %40 : vector<1x32x8xbf16> to vector<32x8xbf16>
    %cst_26 = arith.constant dense<0.000000e+00> : vector<17x8xf32>
    %42 = tpu.matmul %24, %41, %cst_26 {dimension_numbers = #tpu.dot_dimension_numbers<[1], [0], [0], [1], [0, 0, 1, 1], [], []>} : vector<17x32xbf16>, vector<32x8xbf16>, vector<17x8xf32> -> vector<17x8xf32>
    %c8_27 = arith.constant 8 : index
    %c0_28 = arith.constant 0 : index
    %c0_29 = arith.constant 0 : index
    %43 = vector.load %arg5[%c8_27, %c0_28, %c0_29] : memref<12x1x8xf32, #tpu.memory_space<vmem>>, vector<1x1x8xf32>
    %44 = vector.shape_cast %43 : vector<1x1x8xf32> to vector<1x8xf32>
    %45 = vector.broadcast %44 : vector<1x8xf32> to vector<17x8xf32>
    %46 = arith.addf %42, %45 : vector<17x8xf32>
    %47 = arith.truncf %32 : vector<17x8xf32> to vector<17x8xbf16>
    %48 = arith.truncf %39 : vector<17x8xf32> to vector<17x8xbf16>
    %cst_30 = arith.constant dense<0.000000e+00> : vector<17x17xf32>
    %49 = tpu.matmul %47, %48, %cst_30 {dimension_numbers = #tpu.dot_dimension_numbers<[1], [1], [0], [0], [0, 0, 1, 0], [], []>} : vector<17x8xbf16>, vector<17x8xbf16>, vector<17x17xf32> -> vector<17x17xf32>
    %cst_31 = arith.constant 0.353553385 : f32
    %50 = vector.broadcast %cst_31 : f32 to vector<17x17xf32>
    %51 = arith.mulf %49, %50 : vector<17x17xf32>
    %cst_32 = arith.constant dense<0xFF800000> : vector<17xf32>
    %52 = vector.multi_reduction <maximumf>, %51, %cst_32 [1] : vector<17x17xf32> to vector<17xf32>
    %53 = vector.shape_cast %52 : vector<17xf32> to vector<17x1xf32>
    %54 = vector.broadcast %53 : vector<17x1xf32> to vector<17x17xf32>
    %55 = arith.subf %51, %54 : vector<17x17xf32>
    %56 = math.exp %55 : vector<17x17xf32>
    %cst_33 = arith.constant dense<0.000000e+00> : vector<17xf32>
    %57 = vector.multi_reduction <add>, %56, %cst_33 [1] : vector<17x17xf32> to vector<17xf32>
    %58 = vector.shape_cast %57 : vector<17xf32> to vector<17x1xf32>
    %59 = tpu.reciprocal %58 {approx = true} : vector<17x1xf32> -> vector<17x1xf32>
    %60 = vector.broadcast %59 : vector<17x1xf32> to vector<17x17xf32>
    %61 = arith.mulf %56, %60 : vector<17x17xf32>
    %62 = arith.truncf %61 : vector<17x17xf32> to vector<17x17xbf16>
    %63 = arith.truncf %46 : vector<17x8xf32> to vector<17x8xbf16>
    %cst_34 = arith.constant dense<0.000000e+00> : vector<17x8xf32>
    %64 = tpu.matmul %62, %63, %cst_34 {dimension_numbers = #tpu.dot_dimension_numbers<[1], [0], [0], [1], [0, 0, 1, 1], [], []>} : vector<17x17xbf16>, vector<17x8xbf16>, vector<17x8xf32> -> vector<17x8xf32>
    %65 = arith.truncf %64 : vector<17x8xf32> to vector<17x8xbf16>
    %c0_35 = arith.constant 0 : index
    %c0_36 = arith.constant 0 : index
    %c0_37 = arith.constant 0 : index
    %66 = vector.load %arg6[%c0_35, %c0_36, %c0_37] : memref<4x8x32xbf16, #tpu.memory_space<vmem>>, vector<1x8x32xbf16>
    %67 = vector.shape_cast %66 : vector<1x8x32xbf16> to vector<8x32xbf16>
    %cst_38 = arith.constant dense<0.000000e+00> : vector<17x32xf32>
    %68 = tpu.matmul %65, %67, %cst_38 {dimension_numbers = #tpu.dot_dimension_numbers<[1], [0], [0], [1], [0, 0, 1, 1], [], []>} : vector<17x8xbf16>, vector<8x32xbf16>, vector<17x32xf32> -> vector<17x32xf32>
    %69 = arith.addf %25, %68 : vector<17x32xf32>
    %c1 = arith.constant 1 : index
    %c0_39 = arith.constant 0 : index
    %c0_40 = arith.constant 0 : index
    %70 = vector.load %arg4[%c1, %c0_39, %c0_40] : memref<12x32x8xbf16, #tpu.memory_space<vmem>>, vector<1x32x8xbf16>
    %71 = vector.shape_cast %70 : vector<1x32x8xbf16> to vector<32x8xbf16>
    %cst_41 = arith.constant dense<0.000000e+00> : vector<17x8xf32>
    %72 = tpu.matmul %24, %71, %cst_41 {dimension_numbers = #tpu.dot_dimension_numbers<[1], [0], [0], [1], [0, 0, 1, 1], [], []>} : vector<17x32xbf16>, vector<32x8xbf16>, vector<17x8xf32> -> vector<17x8xf32>
    %c1_42 = arith.constant 1 : index
    %c0_43 = arith.constant 0 : index
    %c0_44 = arith.constant 0 : index
    %73 = vector.load %arg5[%c1_42, %c0_43, %c0_44] : memref<12x1x8xf32, #tpu.memory_space<vmem>>, vector<1x1x8xf32>
    %74 = vector.shape_cast %73 : vector<1x1x8xf32> to vector<1x8xf32>
    %75 = vector.broadcast %74 : vector<1x8xf32> to vector<17x8xf32>
    %76 = arith.addf %72, %75 : vector<17x8xf32>
    %c5 = arith.constant 5 : index
    %c0_45 = arith.constant 0 : index
    %c0_46 = arith.constant 0 : index
    %77 = vector.load %arg4[%c5, %c0_45, %c0_46] : memref<12x32x8xbf16, #tpu.memory_space<vmem>>, vector<1x32x8xbf16>
    %78 = vector.shape_cast %77 : vector<1x32x8xbf16> to vector<32x8xbf16>
    %cst_47 = arith.constant dense<0.000000e+00> : vector<17x8xf32>
    %79 = tpu.matmul %24, %78, %cst_47 {dimension_numbers = #tpu.dot_dimension_numbers<[1], [0], [0], [1], [0, 0, 1, 1], [], []>} : vector<17x32xbf16>, vector<32x8xbf16>, vector<17x8xf32> -> vector<17x8xf32>
    %c5_48 = arith.constant 5 : index
    %c0_49 = arith.constant 0 : index
    %c0_50 = arith.constant 0 : index
    %80 = vector.load %arg5[%c5_48, %c0_49, %c0_50] : memref<12x1x8xf32, #tpu.memory_space<vmem>>, vector<1x1x8xf32>
    %81 = vector.shape_cast %80 : vector<1x1x8xf32> to vector<1x8xf32>
    %82 = vector.broadcast %81 : vector<1x8xf32> to vector<17x8xf32>
    %83 = arith.addf %79, %82 : vector<17x8xf32>
    %c9 = arith.constant 9 : index
    %c0_51 = arith.constant 0 : index
    %c0_52 = arith.constant 0 : index
    %84 = vector.load %arg4[%c9, %c0_51, %c0_52] : memref<12x32x8xbf16, #tpu.memory_space<vmem>>, vector<1x32x8xbf16>
    %85 = vector.shape_cast %84 : vector<1x32x8xbf16> to vector<32x8xbf16>
    %cst_53 = arith.constant dense<0.000000e+00> : vector<17x8xf32>
    %86 = tpu.matmul %24, %85, %cst_53 {dimension_numbers = #tpu.dot_dimension_numbers<[1], [0], [0], [1], [0, 0, 1, 1], [], []>} : vector<17x32xbf16>, vector<32x8xbf16>, vector<17x8xf32> -> vector<17x8xf32>
    %c9_54 = arith.constant 9 : index
    %c0_55 = arith.constant 0 : index
    %c0_56 = arith.constant 0 : index
    %87 = vector.load %arg5[%c9_54, %c0_55, %c0_56] : memref<12x1x8xf32, #tpu.memory_space<vmem>>, vector<1x1x8xf32>
    %88 = vector.shape_cast %87 : vector<1x1x8xf32> to vector<1x8xf32>
    %89 = vector.broadcast %88 : vector<1x8xf32> to vector<17x8xf32>
    %90 = arith.addf %86, %89 : vector<17x8xf32>
    %91 = arith.truncf %76 : vector<17x8xf32> to vector<17x8xbf16>
    %92 = arith.truncf %83 : vector<17x8xf32> to vector<17x8xbf16>
    %cst_57 = arith.constant dense<0.000000e+00> : vector<17x17xf32>
    %93 = tpu.matmul %91, %92, %cst_57 {dimension_numbers = #tpu.dot_dimension_numbers<[1], [1], [0], [0], [0, 0, 1, 0], [], []>} : vector<17x8xbf16>, vector<17x8xbf16>, vector<17x17xf32> -> vector<17x17xf32>
    %cst_58 = arith.constant 0.353553385 : f32
    %94 = vector.broadcast %cst_58 : f32 to vector<17x17xf32>
    %95 = arith.mulf %93, %94 : vector<17x17xf32>
    %cst_59 = arith.constant dense<0xFF800000> : vector<17xf32>
    %96 = vector.multi_reduction <maximumf>, %95, %cst_59 [1] : vector<17x17xf32> to vector<17xf32>
    %97 = vector.shape_cast %96 : vector<17xf32> to vector<17x1xf32>
    %98 = vector.broadcast %97 : vector<17x1xf32> to vector<17x17xf32>
    %99 = arith.subf %95, %98 : vector<17x17xf32>
    %100 = math.exp %99 : vector<17x17xf32>
    %cst_60 = arith.constant dense<0.000000e+00> : vector<17xf32>
    %101 = vector.multi_reduction <add>, %100, %cst_60 [1] : vector<17x17xf32> to vector<17xf32>
    %102 = vector.shape_cast %101 : vector<17xf32> to vector<17x1xf32>
    %103 = tpu.reciprocal %102 {approx = true} : vector<17x1xf32> -> vector<17x1xf32>
    %104 = vector.broadcast %103 : vector<17x1xf32> to vector<17x17xf32>
    %105 = arith.mulf %100, %104 : vector<17x17xf32>
    %106 = arith.truncf %105 : vector<17x17xf32> to vector<17x17xbf16>
    %107 = arith.truncf %90 : vector<17x8xf32> to vector<17x8xbf16>
    %cst_61 = arith.constant dense<0.000000e+00> : vector<17x8xf32>
    %108 = tpu.matmul %106, %107, %cst_61 {dimension_numbers = #tpu.dot_dimension_numbers<[1], [0], [0], [1], [0, 0, 1, 1], [], []>} : vector<17x17xbf16>, vector<17x8xbf16>, vector<17x8xf32> -> vector<17x8xf32>
    %109 = arith.truncf %108 : vector<17x8xf32> to vector<17x8xbf16>
    %c1_62 = arith.constant 1 : index
    %c0_63 = arith.constant 0 : index
    %c0_64 = arith.constant 0 : index
    %110 = vector.load %arg6[%c1_62, %c0_63, %c0_64] : memref<4x8x32xbf16, #tpu.memory_space<vmem>>, vector<1x8x32xbf16>
    %111 = vector.shape_cast %110 : vector<1x8x32xbf16> to vector<8x32xbf16>
    %cst_65 = arith.constant dense<0.000000e+00> : vector<17x32xf32>
    %112 = tpu.matmul %109, %111, %cst_65 {dimension_numbers = #tpu.dot_dimension_numbers<[1], [0], [0], [1], [0, 0, 1, 1], [], []>} : vector<17x8xbf16>, vector<8x32xbf16>, vector<17x32xf32> -> vector<17x32xf32>
    %113 = arith.addf %69, %112 : vector<17x32xf32>
    %c2 = arith.constant 2 : index
    %c0_66 = arith.constant 0 : index
    %c0_67 = arith.constant 0 : index
    %114 = vector.load %arg4[%c2, %c0_66, %c0_67] : memref<12x32x8xbf16, #tpu.memory_space<vmem>>, vector<1x32x8xbf16>
    %115 = vector.shape_cast %114 : vector<1x32x8xbf16> to vector<32x8xbf16>
    %cst_68 = arith.constant dense<0.000000e+00> : vector<17x8xf32>
    %116 = tpu.matmul %24, %115, %cst_68 {dimension_numbers = #tpu.dot_dimension_numbers<[1], [0], [0], [1], [0, 0, 1, 1], [], []>} : vector<17x32xbf16>, vector<32x8xbf16>, vector<17x8xf32> -> vector<17x8xf32>
    %c2_69 = arith.constant 2 : index
    %c0_70 = arith.constant 0 : index
    %c0_71 = arith.constant 0 : index
    %117 = vector.load %arg5[%c2_69, %c0_70, %c0_71] : memref<12x1x8xf32, #tpu.memory_space<vmem>>, vector<1x1x8xf32>
    %118 = vector.shape_cast %117 : vector<1x1x8xf32> to vector<1x8xf32>
    %119 = vector.broadcast %118 : vector<1x8xf32> to vector<17x8xf32>
    %120 = arith.addf %116, %119 : vector<17x8xf32>
    %c6 = arith.constant 6 : index
    %c0_72 = arith.constant 0 : index
    %c0_73 = arith.constant 0 : index
    %121 = vector.load %arg4[%c6, %c0_72, %c0_73] : memref<12x32x8xbf16, #tpu.memory_space<vmem>>, vector<1x32x8xbf16>
    %122 = vector.shape_cast %121 : vector<1x32x8xbf16> to vector<32x8xbf16>
    %cst_74 = arith.constant dense<0.000000e+00> : vector<17x8xf32>
    %123 = tpu.matmul %24, %122, %cst_74 {dimension_numbers = #tpu.dot_dimension_numbers<[1], [0], [0], [1], [0, 0, 1, 1], [], []>} : vector<17x32xbf16>, vector<32x8xbf16>, vector<17x8xf32> -> vector<17x8xf32>
    %c6_75 = arith.constant 6 : index
    %c0_76 = arith.constant 0 : index
    %c0_77 = arith.constant 0 : index
    %124 = vector.load %arg5[%c6_75, %c0_76, %c0_77] : memref<12x1x8xf32, #tpu.memory_space<vmem>>, vector<1x1x8xf32>
    %125 = vector.shape_cast %124 : vector<1x1x8xf32> to vector<1x8xf32>
    %126 = vector.broadcast %125 : vector<1x8xf32> to vector<17x8xf32>
    %127 = arith.addf %123, %126 : vector<17x8xf32>
    %c10 = arith.constant 10 : index
    %c0_78 = arith.constant 0 : index
    %c0_79 = arith.constant 0 : index
    %128 = vector.load %arg4[%c10, %c0_78, %c0_79] : memref<12x32x8xbf16, #tpu.memory_space<vmem>>, vector<1x32x8xbf16>
    %129 = vector.shape_cast %128 : vector<1x32x8xbf16> to vector<32x8xbf16>
    %cst_80 = arith.constant dense<0.000000e+00> : vector<17x8xf32>
    %130 = tpu.matmul %24, %129, %cst_80 {dimension_numbers = #tpu.dot_dimension_numbers<[1], [0], [0], [1], [0, 0, 1, 1], [], []>} : vector<17x32xbf16>, vector<32x8xbf16>, vector<17x8xf32> -> vector<17x8xf32>
    %c10_81 = arith.constant 10 : index
    %c0_82 = arith.constant 0 : index
    %c0_83 = arith.constant 0 : index
    %131 = vector.load %arg5[%c10_81, %c0_82, %c0_83] : memref<12x1x8xf32, #tpu.memory_space<vmem>>, vector<1x1x8xf32>
    %132 = vector.shape_cast %131 : vector<1x1x8xf32> to vector<1x8xf32>
    %133 = vector.broadcast %132 : vector<1x8xf32> to vector<17x8xf32>
    %134 = arith.addf %130, %133 : vector<17x8xf32>
    %135 = arith.truncf %120 : vector<17x8xf32> to vector<17x8xbf16>
    %136 = arith.truncf %127 : vector<17x8xf32> to vector<17x8xbf16>
    %cst_84 = arith.constant dense<0.000000e+00> : vector<17x17xf32>
    %137 = tpu.matmul %135, %136, %cst_84 {dimension_numbers = #tpu.dot_dimension_numbers<[1], [1], [0], [0], [0, 0, 1, 0], [], []>} : vector<17x8xbf16>, vector<17x8xbf16>, vector<17x17xf32> -> vector<17x17xf32>
    %cst_85 = arith.constant 0.353553385 : f32
    %138 = vector.broadcast %cst_85 : f32 to vector<17x17xf32>
    %139 = arith.mulf %137, %138 : vector<17x17xf32>
    %cst_86 = arith.constant dense<0xFF800000> : vector<17xf32>
    %140 = vector.multi_reduction <maximumf>, %139, %cst_86 [1] : vector<17x17xf32> to vector<17xf32>
    %141 = vector.shape_cast %140 : vector<17xf32> to vector<17x1xf32>
    %142 = vector.broadcast %141 : vector<17x1xf32> to vector<17x17xf32>
    %143 = arith.subf %139, %142 : vector<17x17xf32>
    %144 = math.exp %143 : vector<17x17xf32>
    %cst_87 = arith.constant dense<0.000000e+00> : vector<17xf32>
    %145 = vector.multi_reduction <add>, %144, %cst_87 [1] : vector<17x17xf32> to vector<17xf32>
    %146 = vector.shape_cast %145 : vector<17xf32> to vector<17x1xf32>
    %147 = tpu.reciprocal %146 {approx = true} : vector<17x1xf32> -> vector<17x1xf32>
    %148 = vector.broadcast %147 : vector<17x1xf32> to vector<17x17xf32>
    %149 = arith.mulf %144, %148 : vector<17x17xf32>
    %150 = arith.truncf %149 : vector<17x17xf32> to vector<17x17xbf16>
    %151 = arith.truncf %134 : vector<17x8xf32> to vector<17x8xbf16>
    %cst_88 = arith.constant dense<0.000000e+00> : vector<17x8xf32>
    %152 = tpu.matmul %150, %151, %cst_88 {dimension_numbers = #tpu.dot_dimension_numbers<[1], [0], [0], [1], [0, 0, 1, 1], [], []>} : vector<17x17xbf16>, vector<17x8xbf16>, vector<17x8xf32> -> vector<17x8xf32>
    %153 = arith.truncf %152 : vector<17x8xf32> to vector<17x8xbf16>
    %c2_89 = arith.constant 2 : index
    %c0_90 = arith.constant 0 : index
    %c0_91 = arith.constant 0 : index
    %154 = vector.load %arg6[%c2_89, %c0_90, %c0_91] : memref<4x8x32xbf16, #tpu.memory_space<vmem>>, vector<1x8x32xbf16>
    %155 = vector.shape_cast %154 : vector<1x8x32xbf16> to vector<8x32xbf16>
    %cst_92 = arith.constant dense<0.000000e+00> : vector<17x32xf32>
    %156 = tpu.matmul %153, %155, %cst_92 {dimension_numbers = #tpu.dot_dimension_numbers<[1], [0], [0], [1], [0, 0, 1, 1], [], []>} : vector<17x8xbf16>, vector<8x32xbf16>, vector<17x32xf32> -> vector<17x32xf32>
    %157 = arith.addf %113, %156 : vector<17x32xf32>
    %c3 = arith.constant 3 : index
    %c0_93 = arith.constant 0 : index
    %c0_94 = arith.constant 0 : index
    %158 = vector.load %arg4[%c3, %c0_93, %c0_94] : memref<12x32x8xbf16, #tpu.memory_space<vmem>>, vector<1x32x8xbf16>
    %159 = vector.shape_cast %158 : vector<1x32x8xbf16> to vector<32x8xbf16>
    %cst_95 = arith.constant dense<0.000000e+00> : vector<17x8xf32>
    %160 = tpu.matmul %24, %159, %cst_95 {dimension_numbers = #tpu.dot_dimension_numbers<[1], [0], [0], [1], [0, 0, 1, 1], [], []>} : vector<17x32xbf16>, vector<32x8xbf16>, vector<17x8xf32> -> vector<17x8xf32>
    %c3_96 = arith.constant 3 : index
    %c0_97 = arith.constant 0 : index
    %c0_98 = arith.constant 0 : index
    %161 = vector.load %arg5[%c3_96, %c0_97, %c0_98] : memref<12x1x8xf32, #tpu.memory_space<vmem>>, vector<1x1x8xf32>
    %162 = vector.shape_cast %161 : vector<1x1x8xf32> to vector<1x8xf32>
    %163 = vector.broadcast %162 : vector<1x8xf32> to vector<17x8xf32>
    %164 = arith.addf %160, %163 : vector<17x8xf32>
    %c7 = arith.constant 7 : index
    %c0_99 = arith.constant 0 : index
    %c0_100 = arith.constant 0 : index
    %165 = vector.load %arg4[%c7, %c0_99, %c0_100] : memref<12x32x8xbf16, #tpu.memory_space<vmem>>, vector<1x32x8xbf16>
    %166 = vector.shape_cast %165 : vector<1x32x8xbf16> to vector<32x8xbf16>
    %cst_101 = arith.constant dense<0.000000e+00> : vector<17x8xf32>
    %167 = tpu.matmul %24, %166, %cst_101 {dimension_numbers = #tpu.dot_dimension_numbers<[1], [0], [0], [1], [0, 0, 1, 1], [], []>} : vector<17x32xbf16>, vector<32x8xbf16>, vector<17x8xf32> -> vector<17x8xf32>
    %c7_102 = arith.constant 7 : index
    %c0_103 = arith.constant 0 : index
    %c0_104 = arith.constant 0 : index
    %168 = vector.load %arg5[%c7_102, %c0_103, %c0_104] : memref<12x1x8xf32, #tpu.memory_space<vmem>>, vector<1x1x8xf32>
    %169 = vector.shape_cast %168 : vector<1x1x8xf32> to vector<1x8xf32>
    %170 = vector.broadcast %169 : vector<1x8xf32> to vector<17x8xf32>
    %171 = arith.addf %167, %170 : vector<17x8xf32>
    %c11 = arith.constant 11 : index
    %c0_105 = arith.constant 0 : index
    %c0_106 = arith.constant 0 : index
    %172 = vector.load %arg4[%c11, %c0_105, %c0_106] : memref<12x32x8xbf16, #tpu.memory_space<vmem>>, vector<1x32x8xbf16>
    %173 = vector.shape_cast %172 : vector<1x32x8xbf16> to vector<32x8xbf16>
    %cst_107 = arith.constant dense<0.000000e+00> : vector<17x8xf32>
    %174 = tpu.matmul %24, %173, %cst_107 {dimension_numbers = #tpu.dot_dimension_numbers<[1], [0], [0], [1], [0, 0, 1, 1], [], []>} : vector<17x32xbf16>, vector<32x8xbf16>, vector<17x8xf32> -> vector<17x8xf32>
    %c11_108 = arith.constant 11 : index
    %c0_109 = arith.constant 0 : index
    %c0_110 = arith.constant 0 : index
    %175 = vector.load %arg5[%c11_108, %c0_109, %c0_110] : memref<12x1x8xf32, #tpu.memory_space<vmem>>, vector<1x1x8xf32>
    %176 = vector.shape_cast %175 : vector<1x1x8xf32> to vector<1x8xf32>
    %177 = vector.broadcast %176 : vector<1x8xf32> to vector<17x8xf32>
    %178 = arith.addf %174, %177 : vector<17x8xf32>
    %179 = arith.truncf %164 : vector<17x8xf32> to vector<17x8xbf16>
    %180 = arith.truncf %171 : vector<17x8xf32> to vector<17x8xbf16>
    %cst_111 = arith.constant dense<0.000000e+00> : vector<17x17xf32>
    %181 = tpu.matmul %179, %180, %cst_111 {dimension_numbers = #tpu.dot_dimension_numbers<[1], [1], [0], [0], [0, 0, 1, 0], [], []>} : vector<17x8xbf16>, vector<17x8xbf16>, vector<17x17xf32> -> vector<17x17xf32>
    %cst_112 = arith.constant 0.353553385 : f32
    %182 = vector.broadcast %cst_112 : f32 to vector<17x17xf32>
    %183 = arith.mulf %181, %182 : vector<17x17xf32>
    %cst_113 = arith.constant dense<0xFF800000> : vector<17xf32>
    %184 = vector.multi_reduction <maximumf>, %183, %cst_113 [1] : vector<17x17xf32> to vector<17xf32>
    %185 = vector.shape_cast %184 : vector<17xf32> to vector<17x1xf32>
    %186 = vector.broadcast %185 : vector<17x1xf32> to vector<17x17xf32>
    %187 = arith.subf %183, %186 : vector<17x17xf32>
    %188 = math.exp %187 : vector<17x17xf32>
    %cst_114 = arith.constant dense<0.000000e+00> : vector<17xf32>
    %189 = vector.multi_reduction <add>, %188, %cst_114 [1] : vector<17x17xf32> to vector<17xf32>
    %190 = vector.shape_cast %189 : vector<17xf32> to vector<17x1xf32>
    %191 = tpu.reciprocal %190 {approx = true} : vector<17x1xf32> -> vector<17x1xf32>
    %192 = vector.broadcast %191 : vector<17x1xf32> to vector<17x17xf32>
    %193 = arith.mulf %188, %192 : vector<17x17xf32>
    %194 = arith.truncf %193 : vector<17x17xf32> to vector<17x17xbf16>
    %195 = arith.truncf %178 : vector<17x8xf32> to vector<17x8xbf16>
    %cst_115 = arith.constant dense<0.000000e+00> : vector<17x8xf32>
    %196 = tpu.matmul %194, %195, %cst_115 {dimension_numbers = #tpu.dot_dimension_numbers<[1], [0], [0], [1], [0, 0, 1, 1], [], []>} : vector<17x17xbf16>, vector<17x8xbf16>, vector<17x8xf32> -> vector<17x8xf32>
    %197 = arith.truncf %196 : vector<17x8xf32> to vector<17x8xbf16>
    %c3_116 = arith.constant 3 : index
    %c0_117 = arith.constant 0 : index
    %c0_118 = arith.constant 0 : index
    %198 = vector.load %arg6[%c3_116, %c0_117, %c0_118] : memref<4x8x32xbf16, #tpu.memory_space<vmem>>, vector<1x8x32xbf16>
    %199 = vector.shape_cast %198 : vector<1x8x32xbf16> to vector<8x32xbf16>
    %cst_119 = arith.constant dense<0.000000e+00> : vector<17x32xf32>
    %200 = tpu.matmul %197, %199, %cst_119 {dimension_numbers = #tpu.dot_dimension_numbers<[1], [0], [0], [1], [0, 0, 1, 1], [], []>} : vector<17x8xbf16>, vector<8x32xbf16>, vector<17x32xf32> -> vector<17x32xf32>
    %201 = arith.addf %157, %200 : vector<17x32xf32>
    %202 = arith.addf %1, %201 : vector<17x32xf32>
    %c0_120 = arith.constant 0 : index
    %c0_121 = arith.constant 0 : index
    %203 = vector.load %arg7[%c0_120, %c0_121] : memref<1x32xf32, #tpu.memory_space<vmem>>, vector<1x32xf32>
    %204 = vector.broadcast %203 : vector<1x32xf32> to vector<17x32xf32>
    %205 = arith.addf %202, %204 : vector<17x32xf32>
    %c0_122 = arith.constant 0 : index
    %c0_123 = arith.constant 0 : index
    %c0_124 = arith.constant 0 : index
    %206 = vector.load %arg8[%c0_122, %c0_123, %c0_124] : memref<1x17x32xf32, #tpu.memory_space<vmem>>, vector<1x17x32xf32>
    %207 = vector.shape_cast %206 : vector<1x17x32xf32> to vector<17x32xf32>
    %208 = vector.shape_cast %205 : vector<17x32xf32> to vector<1x17x32xf32>
    tpu.vector_store %arg8[%c0_122, %c0_123, %c0_124], %208 {strides = array<i32>} : memref<1x17x32xf32, #tpu.memory_space<vmem>>, vector<1x17x32xf32>,
    return
  }
  func.func @transform_0(%arg0: i32) -> (i32, i32, i32) {
    %c0_i32 = arith.constant 0 : i32
    %c0_i32_0 = arith.constant 0 : i32
    %c0_i32_1 = arith.constant 0 : i32
    return %arg0, %c0_i32, %c0_i32_0 : i32, i32, i32
  }
  func.func @transform_1(%arg0: i32) -> (i32, i32) {
    %c0_i32 = arith.constant 0 : i32
    %c0_i32_0 = arith.constant 0 : i32
    %c0_i32_1 = arith.constant 0 : i32
    return %c0_i32, %c0_i32_0 : i32, i32
  }
  func.func @transform_2(%arg0: i32) -> (i32, i32) {
    %c0_i32 = arith.constant 0 : i32
    %c0_i32_0 = arith.constant 0 : i32
    %c0_i32_1 = arith.constant 0 : i32
    return %c0_i32, %c0_i32_0 : i32, i32
  }
  func.func @transform_3(%arg0: i32) -> (i32, i32, i32) {
    %c0_i32 = arith.constant 0 : i32
    %c0_i32_0 = arith.constant 0 : i32
    %c0_i32_1 = arith.constant 0 : i32
    %c0_i32_2 = arith.constant 0 : i32
    return %c0_i32, %c0_i32_0, %c0_i32_1 : i32, i32, i32
  }
  func.func @transform_4(%arg0: i32) -> (i32, i32, i32) {
    %c0_i32 = arith.constant 0 : i32
    %c0_i32_0 = arith.constant 0 : i32
    %c0_i32_1 = arith.constant 0 : i32
    %c0_i32_2 = arith.constant 0 : i32
    return %c0_i32, %c0_i32_0, %c0_i32_1 : i32, i32, i32
  }
  func.func @transform_5(%arg0: i32) -> (i32, i32, i32) {
    %c0_i32 = arith.constant 0 : i32
    %c0_i32_0 = arith.constant 0 : i32
    %c0_i32_1 = arith.constant 0 : i32
    %c0_i32_2 = arith.constant 0 : i32
    return %c0_i32, %c0_i32_0, %c0_i32_1 : i32, i32, i32
  }
  func.func @transform_6(%arg0: i32) -> (i32, i32) {
    %c0_i32 = arith.constant 0 : i32
    %c0_i32_0 = arith.constant 0 : i32
    %c0_i32_1 = arith.constant 0 : i32
    return %c0_i32, %c0_i32_0 : i32, i32
  }
  func.func @transform_7(%arg0: i32) -> (i32, i32, i32) {
    %c0_i32 = arith.constant 0 : i32
    %c0_i32_0 = arith.constant 0 : i32
    %c0_i32_1 = arith.constant 0 : i32
    return %arg0, %c0_i32, %c0_i32_0 : i32, i32, i32
  }
}

module attributes {stable_mosaic.version = 11 : i64} {
  func.func @kernel(%arg0: i32, %arg1: memref<1x17x32xf32, #tpu.memory_space<vmem>>, %arg2: memref<1x32xf32, #tpu.memory_space<vmem>>, %arg3: memref<1x32xf32, #tpu.memory_space<vmem>>, %arg4: memref<32x128xbf16, #tpu.memory_space<vmem>>, %arg5: memref<1x128xf32, #tpu.memory_space<vmem>>, %arg6: memref<128x32xbf16, #tpu.memory_space<vmem>>, %arg7: memref<1x32xf32, #tpu.memory_space<vmem>>, %arg8: memref<1x17x32xf32, #tpu.memory_space<vmem>>) attributes {dimension_semantics = [#tpu.dimension_semantics<parallel>], iteration_bounds = array<i64: 2>, scalar_prefetch = 0 : i64, scratch_operands = 0 : i64, tpu.core_type = #tpu.core_type<tc>, window_params = [{transform_indices = @transform_0, window_bounds = array<i64: 1, 17, 32>}, {pipeline_mode = #tpu.pipeline_mode<synchronous>, transform_indices = @transform_1, window_bounds = array<i64: 1, 32>}, {pipeline_mode = #tpu.pipeline_mode<synchronous>, transform_indices = @transform_2, window_bounds = array<i64: 1, 32>}, {pipeline_mode = #tpu.pipeline_mode<synchronous>, transform_indices = @transform_3, window_bounds = array<i64: 32, 128>}, {pipeline_mode = #tpu.pipeline_mode<synchronous>, transform_indices = @transform_4, window_bounds = array<i64: 1, 128>}, {pipeline_mode = #tpu.pipeline_mode<synchronous>, transform_indices = @transform_5, window_bounds = array<i64: 128, 32>}, {pipeline_mode = #tpu.pipeline_mode<synchronous>, transform_indices = @transform_6, window_bounds = array<i64: 1, 32>}, {transform_indices = @transform_7, window_bounds = array<i64: 1, 17, 32>}]} {
    %c0 = arith.constant 0 : index
    %c0_0 = arith.constant 0 : index
    %c0_1 = arith.constant 0 : index
    %0 = vector.load %arg1[%c0, %c0_0, %c0_1] : memref<1x17x32xf32, #tpu.memory_space<vmem>>, vector<1x17x32xf32>
    %1 = vector.shape_cast %0 : vector<1x17x32xf32> to vector<17x32xf32>
    %c0_2 = arith.constant 0 : index
    %c0_3 = arith.constant 0 : index
    %2 = vector.load %arg2[%c0_2, %c0_3] : memref<1x32xf32, #tpu.memory_space<vmem>>, vector<1x32xf32>
    %c0_4 = arith.constant 0 : index
    %c0_5 = arith.constant 0 : index
    %3 = vector.load %arg3[%c0_4, %c0_5] : memref<1x32xf32, #tpu.memory_space<vmem>>, vector<1x32xf32>
    %cst = arith.constant dense<0.000000e+00> : vector<17xf32>
    %4 = vector.multi_reduction <add>, %1, %cst [1] : vector<17x32xf32> to vector<17xf32>
    %5 = vector.shape_cast %4 : vector<17xf32> to vector<17x1xf32>
    %cst_6 = arith.constant 3.200000e+01 : f32
    %6 = vector.broadcast %cst_6 : f32 to vector<17x1xf32>
    %7 = arith.divf %5, %6 : vector<17x1xf32>
    %8 = vector.broadcast %7 : vector<17x1xf32> to vector<17x32xf32>
    %9 = arith.subf %1, %8 : vector<17x32xf32>
    %10 = arith.mulf %9, %9 : vector<17x32xf32>
    %cst_7 = arith.constant dense<0.000000e+00> : vector<17xf32>
    %11 = vector.multi_reduction <add>, %10, %cst_7 [1] : vector<17x32xf32> to vector<17xf32>
    %12 = vector.shape_cast %11 : vector<17xf32> to vector<17x1xf32>
    %cst_8 = arith.constant 3.200000e+01 : f32
    %13 = vector.broadcast %cst_8 : f32 to vector<17x1xf32>
    %14 = arith.divf %12, %13 : vector<17x1xf32>
    %cst_9 = arith.constant 9.99999974E-6 : f32
    %15 = vector.broadcast %cst_9 : f32 to vector<17x1xf32>
    %16 = arith.addf %14, %15 : vector<17x1xf32>
    %17 = math.rsqrt %16 : vector<17x1xf32>
    %18 = vector.broadcast %17 : vector<17x1xf32> to vector<17x32xf32>
    %19 = arith.mulf %9, %18 : vector<17x32xf32>
    %20 = vector.broadcast %2 : vector<1x32xf32> to vector<17x32xf32>
    %21 = arith.mulf %19, %20 : vector<17x32xf32>
    %22 = vector.broadcast %3 : vector<1x32xf32> to vector<17x32xf32>
    %23 = arith.addf %21, %22 : vector<17x32xf32>
    %24 = arith.truncf %23 : vector<17x32xf32> to vector<17x32xbf16>
    %c0_10 = arith.constant 0 : index
    %c0_11 = arith.constant 0 : index
    %25 = vector.load %arg4[%c0_10, %c0_11] : memref<32x128xbf16, #tpu.memory_space<vmem>>, vector<32x128xbf16>
    %cst_12 = arith.constant dense<0.000000e+00> : vector<17x128xf32>
    %26 = tpu.matmul %24, %25, %cst_12 {dimension_numbers = #tpu.dot_dimension_numbers<[1], [0], [0], [1], [0, 0, 1, 1], [], []>} : vector<17x32xbf16>, vector<32x128xbf16>, vector<17x128xf32> -> vector<17x128xf32>
    %c0_13 = arith.constant 0 : index
    %c0_14 = arith.constant 0 : index
    %27 = vector.load %arg5[%c0_13, %c0_14] : memref<1x128xf32, #tpu.memory_space<vmem>>, vector<1x128xf32>
    %28 = vector.broadcast %27 : vector<1x128xf32> to vector<17x128xf32>
    %29 = arith.addf %26, %28 : vector<17x128xf32>
    %cst_15 = arith.constant 1.702000e+00 : f32
    %30 = vector.broadcast %cst_15 : f32 to vector<17x128xf32>
    %31 = arith.mulf %30, %29 : vector<17x128xf32>
    %32 = arith.negf %31 : vector<17x128xf32>
    %33 = math.exp %32 : vector<17x128xf32>
    %cst_16 = arith.constant 1.000000e+00 : f32
    %34 = vector.broadcast %cst_16 : f32 to vector<17x128xf32>
    %35 = arith.addf %34, %33 : vector<17x128xf32>
    %36 = arith.divf %34, %35 : vector<17x128xf32>
    %37 = arith.mulf %29, %36 : vector<17x128xf32>
    %38 = arith.truncf %37 : vector<17x128xf32> to vector<17x128xbf16>
    %c0_17 = arith.constant 0 : index
    %c0_18 = arith.constant 0 : index
    %39 = vector.load %arg6[%c0_17, %c0_18] : memref<128x32xbf16, #tpu.memory_space<vmem>>, vector<128x32xbf16>
    %cst_19 = arith.constant dense<0.000000e+00> : vector<17x32xf32>
    %40 = tpu.matmul %38, %39, %cst_19 {dimension_numbers = #tpu.dot_dimension_numbers<[1], [0], [0], [1], [0, 0, 1, 1], [], []>} : vector<17x128xbf16>, vector<128x32xbf16>, vector<17x32xf32> -> vector<17x32xf32>
    %c0_20 = arith.constant 0 : index
    %c0_21 = arith.constant 0 : index
    %41 = vector.load %arg7[%c0_20, %c0_21] : memref<1x32xf32, #tpu.memory_space<vmem>>, vector<1x32xf32>
    %42 = vector.broadcast %41 : vector<1x32xf32> to vector<17x32xf32>
    %43 = arith.addf %40, %42 : vector<17x32xf32>
    %44 = arith.addf %1, %43 : vector<17x32xf32>
    %c0_22 = arith.constant 0 : index
    %c0_23 = arith.constant 0 : index
    %c0_24 = arith.constant 0 : index
    %45 = vector.load %arg8[%c0_22, %c0_23, %c0_24] : memref<1x17x32xf32, #tpu.memory_space<vmem>>, vector<1x17x32xf32>
    %46 = vector.shape_cast %45 : vector<1x17x32xf32> to vector<17x32xf32>
    %47 = vector.shape_cast %44 : vector<17x32xf32> to vector<1x17x32xf32>
    tpu.vector_store %arg8[%c0_22, %c0_23, %c0_24], %47 {strides = array<i32>} : memref<1x17x32xf32, #tpu.memory_space<vmem>>, vector<1x17x32xf32>,
    return
  }
  func.func @transform_0(%arg0: i32) -> (i32, i32, i32) {
    %c0_i32 = arith.constant 0 : i32
    %c0_i32_0 = arith.constant 0 : i32
    %c0_i32_1 = arith.constant 0 : i32
    return %arg0, %c0_i32, %c0_i32_0 : i32, i32, i32
  }
  func.func @transform_1(%arg0: i32) -> (i32, i32) {
    %c0_i32 = arith.constant 0 : i32
    %c0_i32_0 = arith.constant 0 : i32
    %c0_i32_1 = arith.constant 0 : i32
    return %c0_i32, %c0_i32_0 : i32, i32
  }
  func.func @transform_2(%arg0: i32) -> (i32, i32) {
    %c0_i32 = arith.constant 0 : i32
    %c0_i32_0 = arith.constant 0 : i32
    %c0_i32_1 = arith.constant 0 : i32
    return %c0_i32, %c0_i32_0 : i32, i32
  }
  func.func @transform_3(%arg0: i32) -> (i32, i32) {
    %c0_i32 = arith.constant 0 : i32
    %c0_i32_0 = arith.constant 0 : i32
    %c0_i32_1 = arith.constant 0 : i32
    return %c0_i32, %c0_i32_0 : i32, i32
  }
  func.func @transform_4(%arg0: i32) -> (i32, i32) {
    %c0_i32 = arith.constant 0 : i32
    %c0_i32_0 = arith.constant 0 : i32
    %c0_i32_1 = arith.constant 0 : i32
    return %c0_i32, %c0_i32_0 : i32, i32
  }
  func.func @transform_5(%arg0: i32) -> (i32, i32) {
    %c0_i32 = arith.constant 0 : i32
    %c0_i32_0 = arith.constant 0 : i32
    %c0_i32_1 = arith.constant 0 : i32
    return %c0_i32, %c0_i32_0 : i32, i32
  }
  func.func @transform_6(%arg0: i32) -> (i32, i32) {
    %c0_i32 = arith.constant 0 : i32
    %c0_i32_0 = arith.constant 0 : i32
    %c0_i32_1 = arith.constant 0 : i32
    return %c0_i32, %c0_i32_0 : i32, i32
  }
  func.func @transform_7(%arg0: i32) -> (i32, i32, i32) {
    %c0_i32 = arith.constant 0 : i32
    %c0_i32_0 = arith.constant 0 : i32
    %c0_i32_1 = arith.constant 0 : i32
    return %arg0, %c0_i32, %c0_i32_0 : i32, i32, i32
  }
}

module attributes {stable_mosaic.version = 11 : i64} {
  func.func @kernel(%arg0: i32, %arg1: memref<2x32xf32, #tpu.memory_space<vmem>>, %arg2: memref<1x32xf32, #tpu.memory_space<vmem>>, %arg3: memref<1x32xf32, #tpu.memory_space<vmem>>, %arg4: memref<32x16xbf16, #tpu.memory_space<vmem>>, %arg5: memref<16x10xbf16, #tpu.memory_space<vmem>>, %arg6: memref<1x10xf32, #tpu.memory_space<vmem>>, %arg7: memref<2x10xf32, #tpu.memory_space<vmem>>) attributes {dimension_semantics = [#tpu.dimension_semantics<arbitrary>], iteration_bounds = array<i64: 1>, scalar_prefetch = 0 : i64, scratch_operands = 0 : i64, tpu.core_type = #tpu.core_type<tc>, window_params = [{pipeline_mode = #tpu.pipeline_mode<synchronous>, transform_indices = @transform_0, window_bounds = array<i64: 2, 32>}, {pipeline_mode = #tpu.pipeline_mode<synchronous>, transform_indices = @transform_1, window_bounds = array<i64: 1, 32>}, {pipeline_mode = #tpu.pipeline_mode<synchronous>, transform_indices = @transform_2, window_bounds = array<i64: 1, 32>}, {pipeline_mode = #tpu.pipeline_mode<synchronous>, transform_indices = @transform_3, window_bounds = array<i64: 32, 16>}, {pipeline_mode = #tpu.pipeline_mode<synchronous>, transform_indices = @transform_4, window_bounds = array<i64: 16, 10>}, {pipeline_mode = #tpu.pipeline_mode<synchronous>, transform_indices = @transform_5, window_bounds = array<i64: 1, 10>}, {pipeline_mode = #tpu.pipeline_mode<synchronous>, transform_indices = @transform_6, window_bounds = array<i64: 2, 10>}]} {
    %c0 = arith.constant 0 : index
    %c0_0 = arith.constant 0 : index
    %0 = vector.load %arg1[%c0, %c0_0] : memref<2x32xf32, #tpu.memory_space<vmem>>, vector<2x32xf32>
    %c0_1 = arith.constant 0 : index
    %c0_2 = arith.constant 0 : index
    %1 = vector.load %arg2[%c0_1, %c0_2] : memref<1x32xf32, #tpu.memory_space<vmem>>, vector<1x32xf32>
    %c0_3 = arith.constant 0 : index
    %c0_4 = arith.constant 0 : index
    %2 = vector.load %arg3[%c0_3, %c0_4] : memref<1x32xf32, #tpu.memory_space<vmem>>, vector<1x32xf32>
    %cst = arith.constant dense<0.000000e+00> : vector<2xf32>
    %3 = vector.multi_reduction <add>, %0, %cst [1] : vector<2x32xf32> to vector<2xf32>
    %4 = vector.shape_cast %3 : vector<2xf32> to vector<2x1xf32>
    %cst_5 = arith.constant 3.200000e+01 : f32
    %5 = vector.broadcast %cst_5 : f32 to vector<2x1xf32>
    %6 = arith.divf %4, %5 : vector<2x1xf32>
    %7 = vector.broadcast %6 : vector<2x1xf32> to vector<2x32xf32>
    %8 = arith.subf %0, %7 : vector<2x32xf32>
    %9 = arith.mulf %8, %8 : vector<2x32xf32>
    %cst_6 = arith.constant dense<0.000000e+00> : vector<2xf32>
    %10 = vector.multi_reduction <add>, %9, %cst_6 [1] : vector<2x32xf32> to vector<2xf32>
    %11 = vector.shape_cast %10 : vector<2xf32> to vector<2x1xf32>
    %cst_7 = arith.constant 3.200000e+01 : f32
    %12 = vector.broadcast %cst_7 : f32 to vector<2x1xf32>
    %13 = arith.divf %11, %12 : vector<2x1xf32>
    %cst_8 = arith.constant 9.99999974E-6 : f32
    %14 = vector.broadcast %cst_8 : f32 to vector<2x1xf32>
    %15 = arith.addf %13, %14 : vector<2x1xf32>
    %16 = math.rsqrt %15 : vector<2x1xf32>
    %17 = vector.broadcast %16 : vector<2x1xf32> to vector<2x32xf32>
    %18 = arith.mulf %8, %17 : vector<2x32xf32>
    %19 = vector.broadcast %1 : vector<1x32xf32> to vector<2x32xf32>
    %20 = arith.mulf %18, %19 : vector<2x32xf32>
    %21 = vector.broadcast %2 : vector<1x32xf32> to vector<2x32xf32>
    %22 = arith.addf %20, %21 : vector<2x32xf32>
    %23 = arith.truncf %22 : vector<2x32xf32> to vector<2x32xbf16>
    %c0_9 = arith.constant 0 : index
    %c0_10 = arith.constant 0 : index
    %24 = vector.load %arg4[%c0_9, %c0_10] : memref<32x16xbf16, #tpu.memory_space<vmem>>, vector<32x16xbf16>
    %cst_11 = arith.constant dense<0.000000e+00> : vector<2x16xf32>
    %25 = tpu.matmul %23, %24, %cst_11 {dimension_numbers = #tpu.dot_dimension_numbers<[1], [0], [0], [1], [0, 0, 1, 1], [], []>} : vector<2x32xbf16>, vector<32x16xbf16>, vector<2x16xf32> -> vector<2x16xf32>
    %26 = arith.truncf %25 : vector<2x16xf32> to vector<2x16xbf16>
    %c0_12 = arith.constant 0 : index
    %c0_13 = arith.constant 0 : index
    %27 = vector.load %arg5[%c0_12, %c0_13] : memref<16x10xbf16, #tpu.memory_space<vmem>>, vector<16x10xbf16>
    %cst_14 = arith.constant dense<0.000000e+00> : vector<2x10xf32>
    %28 = tpu.matmul %26, %27, %cst_14 {dimension_numbers = #tpu.dot_dimension_numbers<[1], [0], [0], [1], [0, 0, 1, 1], [], []>} : vector<2x16xbf16>, vector<16x10xbf16>, vector<2x10xf32> -> vector<2x10xf32>
    %c0_15 = arith.constant 0 : index
    %c0_16 = arith.constant 0 : index
    %29 = vector.load %arg6[%c0_15, %c0_16] : memref<1x10xf32, #tpu.memory_space<vmem>>, vector<1x10xf32>
    %30 = vector.broadcast %29 : vector<1x10xf32> to vector<2x10xf32>
    %31 = arith.addf %28, %30 : vector<2x10xf32>
    %c0_17 = arith.constant 0 : index
    %c0_18 = arith.constant 0 : index
    %32 = vector.load %arg7[%c0_17, %c0_18] : memref<2x10xf32, #tpu.memory_space<vmem>>, vector<2x10xf32>
    tpu.vector_store %arg7[%c0_17, %c0_18], %31 {strides = array<i32>} : memref<2x10xf32, #tpu.memory_space<vmem>>, vector<2x10xf32>,
    return
  }
  func.func @transform_0(%arg0: i32) -> (i32, i32) {
    %c0_i32 = arith.constant 0 : i32
    %c0_i32_0 = arith.constant 0 : i32
    %c0_i32_1 = arith.constant 0 : i32
    return %c0_i32, %c0_i32_0 : i32, i32
  }
  func.func @transform_1(%arg0: i32) -> (i32, i32) {
    %c0_i32 = arith.constant 0 : i32
    %c0_i32_0 = arith.constant 0 : i32
    %c0_i32_1 = arith.constant 0 : i32
    return %c0_i32, %c0_i32_0 : i32, i32
  }
  func.func @transform_2(%arg0: i32) -> (i32, i32) {
    %c0_i32 = arith.constant 0 : i32
    %c0_i32_0 = arith.constant 0 : i32
    %c0_i32_1 = arith.constant 0 : i32
    return %c0_i32, %c0_i32_0 : i32, i32
  }
  func.func @transform_3(%arg0: i32) -> (i32, i32) {
    %c0_i32 = arith.constant 0 : i32
    %c0_i32_0 = arith.constant 0 : i32
    %c0_i32_1 = arith.constant 0 : i32
    return %c0_i32, %c0_i32_0 : i32, i32
  }
  func.func @transform_4(%arg0: i32) -> (i32, i32) {
    %c0_i32 = arith.constant 0 : i32
    %c0_i32_0 = arith.constant 0 : i32
    %c0_i32_1 = arith.constant 0 : i32
    return %c0_i32, %c0_i32_0 : i32, i32
  }
  func.func @transform_5(%arg0: i32) -> (i32, i32) {
    %c0_i32 = arith.constant 0 : i32
    %c0_i32_0 = arith.constant 0 : i32
    %c0_i32_1 = arith.constant 0 : i32
    return %c0_i32, %c0_i32_0 : i32, i32
  }
  func.func @transform_6(%arg0: i32) -> (i32, i32) {
    %c0_i32 = arith.constant 0 : i32
    %c0_i32_0 = arith.constant 0 : i32
    %c0_i32_1 = arith.constant 0 : i32
    return %c0_i32, %c0_i32_0 : i32, i32
  }
}

</mosaic_0001>

<bundles_post_ra>
// kernel: clip_image_encoder_forward.8
= control target key start
LH: loop header
LB: loop body
LE: loop exit
PB: predicated region body
PF: predicated region fallthrough
CT: control target
= control target key end

     0   :  { %s785_s24 = smov 0   ;;  %s877_s0 = inlined_call_operand.vmem [shape: f32[2,17,32], index: 0, kind: input, shape index: {}]   ;;  %s878_s1 = inlined_call_operand.vmem [shape: f32[1,32], index: 1, kind: input, shape index: {}]   ;;  %s879_s2 = inlined_call_operand.vmem [shape: f32[1,32], index: 2, kind: input, shape index: {}]   ;;  %s880_s3 = inlined_call_operand.vmem [shape: bf16[32,128], index: 3, kind: input, shape index: {}]   ;;  %s881_s4 = inlined_call_operand.vmem [shape: f32[1,128], index: 4, kind: input, shape index: {}]   ;;  %s882_s5 = inlined_call_operand.vmem [shape: bf16[128,32], index: 5, kind: input, shape index: {}]   ;;  %s883_s6 = inlined_call_operand.vmem [shape: f32[1,32], index: 6, kind: input, shape index: {}]   ;;  %s884_s7 = inlined_call_operand.vmem [shape: f32[2,17,32], index: 7, kind: output, shape index: {}]  }
   0x1 LB: > { %s630_s25 = sadd.s32 4294967295, %s743_s24   ;;  %p634_p0 = scmp.ge.s32.totalorder %s743_s24, 1  ;;  %s743_s24 = sphi %s785_s24, %s17_s24  }
   0x2   : > { %p237_p1 = scmp.lt.s32.totalorder %s743_s24, 3 }
   0x4   : > { %p238_p2 = pnand %p634_p0, %p237_p1 }
   0x5   : > { %p269_p3 = scmp.lt.s32.totalorder (!%p238_p2), %s630_s25, 1  ;;  %vm285_vm0 = vcmask (!%p238_p2), 261120   ;;  %vm292_vm1 = vcmask (!%p238_p2), 253952   ;;  %v709_v21 = vld [vmem:[%s880_s3] sm:$0xff] (!%p238_p2)   ;;  %v710_v22 = vld [vmem:[%s880_s3 + $0x8] sm:$0xff] (!%p238_p2)   ;;  %v713_v50 = vld [vmem:[%s882_s5 + $0x10] sm:$0xff] (!%p238_p2)  }
   0x6   : > { %241 = sbr.rel (%p238_p2) target bundleno = 809 (0x329), region = 48  ;;  %672 = vmatprep.subr.bf16.mxu0 (!%p238_p2), %v709_v21  ;;  %v637_v34 = vld [vmem:[%s878_s1] ss:$0 sm:$0xff] (!%p238_p2)  ;;  %v712_v49 = vld [vmem:[%s882_s5 + $0x8] sm:$0xff] (!%p238_p2)   ;;  %v714_v51 = vld [vmem:[%s882_s5 + $0x18] sm:$0xff] (!%p238_p2)  }
   0x7   : > { %673 = vmatpush3.bf16.msra.mxu0 (!%p238_p2), %v709_v21  ;;  %v638_v40 = vld [vmem:[%s879_s2] ss:$0 sm:$0xff] (!%p238_p2)  ;;  %v716_v53 = vld [vmem:[%s882_s5 + $0x28] sm:$0xff] (!%p238_p2)   ;;  %v717_v54 = vld [vmem:[%s882_s5 + $0x30] sm:$0xff] (!%p238_p2)  }
   0x8   : > { %674 = vmatprep.subr.bf16.mxu0 (!%p238_p2), %v710_v22  ;;  %v711_v48 = vld [vmem:[%s882_s5] sm:$0xff] (!%p238_p2)   ;;  %v718_v55 = vld [vmem:[%s882_s5 + $0x38] sm:$0xff] (!%p238_p2)  }
   0x9   : > { %680 = vmatprep.subr.bf16.mxu1 (!%p238_p2), %v711_v48  ;;  %v715_v52 = vld [vmem:[%s882_s5 + $0x20] sm:$0xff] (!%p238_p2)  }
   0xa   : > { %681 = vmatpush3.bf16.msra.mxu1 (!%p238_p2), %v711_v48  ;;  %v639_v56 = vld [vmem:[%s881_s4] ss:$0 sm:$0xff] (!%p238_p2) }
   0xb   : > { %675 = vmatpush3.bf16.msra.mxu0 (!%p238_p2), %v710_v22  ;;  %682 = vmatprep.subr.bf16.mxu1 (!%p238_p2), %v712_v49 }
   0xd   : > { %s886_s25 = smov (!%p269_p3, %s630_s25), 1 }
   0xe   : > { %s700_s26 = smul.u32 24, %s886_s25  ;;  %683 = vmatpush3.bf16.msra.mxu1 %v712_v49 }
   0xf   : > { %684 = vmatprep.subr.bf16.mxu1 %v713_v50 }
  0x10   : > { %s273_s29 = scalar_lea.vmem %s877_s0, %s700_s26  ;;  %s278_s17 = scalar_lea.vmem %s884_s7, %s700_s26 }
  0x11   : > { %v801_v0 = vld [vmem:[%s273_s29] sm:$0xff]  ;;  %v803_v1 = vld [vmem:[%s273_s29 + $0x10] sm:$0x1]  ;;  %v805_v2 = vld [vmem:[%s273_s29 + $0x8] sm:$0xff] }
  0x12   : > { %v286_v3 = vsel %vm285_vm0, %v801_v0, 0.0  ;;  %v293_v4 = vsel %vm292_vm1, %v803_v1, 0.0  ;;  %v289_v5 = vsel %vm285_vm0, %v805_v2, 0.0  ;;  %685 = vmatpush3.bf16.msra.mxu1 %v713_v50 }
  0x13   : > { %287 = vadd.xlane.f32.xlu0 %v286_v3  ;;  %294 = vadd.xlane.f32.xlu1 %v293_v4 }
  0x14   : > { %686 = vmatprep.subr.bf16.mxu1 %v714_v51 }
  0x16   : > { %687 = vmatpush3.bf16.msra.mxu1 %v714_v51 }
  0x17   : > { %290 = vadd.xlane.f32.xlu0 %v289_v5  ;;  %688 = vmatprep.subr.bf16.mxu1 %v715_v52 }
  0x1a   : > { %689 = vmatpush3.bf16.msra.mxu1 %v715_v52 }
  0x1b   : > { %690 = vmatprep.subr.bf16.mxu1 %v716_v53 }
  0x1e   : > { %691 = vmatpush3.bf16.msra.mxu1 %v716_v53 }
  0x1f   : > { %692 = vmatprep.subr.bf16.mxu1 %v717_v54 }
  0x22   : > { %693 = vmatpush3.bf16.msra.mxu1 %v717_v54 }
  0x23   : > { %694 = vmatprep.subr.bf16.mxu1 %v718_v55 }
  0x26   : > { %695 = vmatpush3.bf16.msra.mxu1 %v718_v55 }
  0xa0   : > { %v288_v6 = vpop.xlane.xlu0 %287  ;;  %v295_v7 = vpop.xlane.xlu1 %294 }
  0xa1   : > { %v297_v8 = vmul.f32 0.03125, %v288_v6  ;;  %v299_v9 = vmul.f32 0.03125, %v295_v7 }
  0xa3   : > { %v300_v10 = vsub.f32 %v801_v0, %v297_v8  ;;  %v302_v11 = vsub.f32 %v803_v1, %v299_v9 }
  0xa4   : > { %v291_v12 = vpop.xlane.xlu0 %290 }
  0xa5   : > { %v298_v13 = vmul.f32 0.03125, %v291_v12  ;;  %v303_v14 = vmul.f32 %v300_v10, %v300_v10  ;;  %v305_v15 = vmul.f32 %v302_v11, %v302_v11 }
  0xa7   : > { %v301_v16 = vsub.f32 %v805_v2, %v298_v13  ;;  %v306_v17 = vsel %vm285_vm0, %v303_v14, 0.0  ;;  %v312_v18 = vsel %vm292_vm1, %v305_v15, 0.0 }
  0xa8   : > { %307 = vadd.xlane.f32.xlu1 %v306_v17 }
  0xa9   : > { %v304_v19 = vmul.f32 %v301_v16, %v301_v16 }
  0xab   : > { %v309_v20 = vsel %vm285_vm0, %v304_v19, 0.0 }
  0xac   : > { %313 = vadd.xlane.f32.xlu1 %v312_v18  ;;  %310 = vadd.xlane.f32.xlu0 %v309_v20 }
 0x135   : > { %v308_v23 = vpop.xlane.xlu1 %307 }
 0x136   : > { %v315_v24 = vmul.f32 0.03125, %v308_v23  ;;  %v647_v23 = vld [vmem:[%s883_s6] ss:$0 sm:$0xff] }
 0x138   : > { %v318_v25 = vadd.f32 1e-05, %v315_v24 }
 0x139   : > { %v314_v26 = vpop.xlane.xlu1 %313  ;;  %v311_v27 = vpop.xlane.xlu0 %310 }
 0x13a   : > { %719 = vrsqrt.f32 %v318_v25  ;;  %v317_v28 = vmul.f32 0.03125, %v314_v26  ;;  %v316_v29 = vmul.f32 0.03125, %v311_v27 }
 0x13c   : > { %v320_v30 = vadd.f32 1e-05, %v317_v28  ;;  %v319_v31 = vadd.f32 1e-05, %v316_v29 }
 0x13e   : > { %721 = vrsqrt.f32 %v320_v30 }
 0x13f   : > { %723 = vrsqrt.f32 %v319_v31 }
 0x144   : > { %v720_v32 = vpop.eup %719 }
 0x145   : > { %v324_v33 = vmul.f32 %v720_v32, %v300_v10 }
 0x147   : > { %v333_v39 = vmul.f32 %v637_v34, %v324_v33 }
 0x148   : > { %v722_v35 = vpop.eup %721 }
 0x149   : > { %v724_v36 = vpop.eup %723  ;;  %v326_v37 = vmul.f32 %v722_v35, %v302_v11  ;;  %v342_v44 = vadd.f32 %v638_v40, %v333_v39 }
 0x14a   : > { %v325_v38 = vmul.f32 %v724_v36, %v301_v16 }
 0x14b   : > { %v335_v41 = vmul.f32 %v637_v34, %v326_v37 }
 0x14c   : > { %v334_v42 = vmul.f32 %v637_v34, %v325_v38 }
 0x14d   : > { %v344_v43 = vadd.f32 %v638_v40, %v335_v41 }
 0x14e   : > { %v343_v45 = vadd.f32 %v638_v40, %v334_v42 }
 0x14f   : > { %v346_v46 = vpack.c.bf16 %v344_v43, %v344_v43 }
 0x150   : > { %v345_v47 = vpack.c.bf16 %v343_v45, %v342_v44 }
 0x152   : > { %676 = vmatprep.mubr.msk.bf16.mxu0 %vm285_vm0, %v345_v47 }
 0x153   : > { %677 = vmatmul.mubr.msk.bf16.vlgmr.msra.gmra.mrb[0].mxu0 %vm285_vm0, %v346_v46 }
 0x226   : > { %v678_v57 = vpop.f32.mrb[0].mxu0 }
 0x227   : > { %v419_v58 = vadd.f32 %v678_v57, %v639_v56  ;;  %v410_v59 = vpop.f32.mrb[1].mxu0 }
 0x228   : > { %v411_v60 = vadd.f32 %v639_v56, %v410_v59  ;;  %v679_v61 = vpop.f32.mrb[2].mxu0 }
 0x229   : > { %v646_v62 = vmul.f32 -1.702, %v419_v58  ;;  %v413_v63 = vpop.f32.mrb[3].mxu0 }
 0x22a   : > { %v644_v3 = vmul.f32 -1.702, %v411_v60  ;;  %v414_v4 = vadd.f32 %v639_v56, %v413_v63 }
 0x22b   : > { %v434_v5 = vmul.f32 1.442695, %v646_v62 }
 0x22c   : > { %v430_v6 = vmul.f32 1.442695, %v644_v3  ;;  %v645_v7 = vmul.f32 -1.702, %v414_v4 }
 0x22d   : > { %725 = vpow2.f32 %v434_v5 }
 0x22e   : > { %727 = vpow2.f32 %v430_v6  ;;  %v432_v8 = vmul.f32 1.442695, %v645_v7 }
 0x230   : > { %729 = vpow2.f32 %v432_v8 }
 0x237   : > { %v726_v9 = vpop.eup %725 }
 0x238   : > { %v728_v10 = vpop.eup %727  ;;  %v438_v11 = vadd.f32 1.0, %v726_v9 }
 0x239   : > { %v436_v12 = vadd.f32 1.0, %v728_v10 }
 0x23a   : > { %v730_v13 = vpop.eup %729  ;;  %731 = vrcp.f32 %v438_v11 }
 0x23b   : > { %733 = vrcp.f32 %v436_v12  ;;  %v437_v14 = vadd.f32 1.0, %v730_v13 }
 0x23d   : > { %735 = vrcp.f32 %v437_v14 }
 0x244   : > { %v732_v15 = vpop.eup %731 }
 0x245   : > { %v734_v16 = vpop.eup %733  ;;  %v447_v18 = vmul.f32 %v732_v15, %v419_v58 }
 0x246   : > { %v445_v19 = vmul.f32 %v734_v16, %v411_v60 }
 0x247   : > { %v736_v17 = vpop.eup %735  ;;  %v449_v22 = vpack.c.bf16 %v447_v18, %v447_v18 }
 0x248   : > { %v446_v20 = vmul.f32 %v736_v17, %v414_v4 }
 0x24a   : > { %v448_v21 = vpack.c.bf16 %v446_v20, %v445_v19 }
 0x24c   : > { %696 = vmatprep.mubr.bf16.mxu1 %v448_v21 }
 0x24d   : > { %697 = vmatmul.mubr.bf16.vlgmr.msra.gmra.mrb[0].mxu1 %v449_v22 }
 0x320   : > { %v698_v24 = vpop.f32.mrb[0].mxu1 }
 0x321   : > { %v564_v25 = vadd.f32 %v698_v24, %v647_v23  ;;  %v555_v26 = vpop.f32.mrb[1].mxu1 }
 0x322   : > { %v556_v27 = vadd.f32 %v647_v23, %v555_v26  ;;  %v699_v28 = vpop.f32.mrb[2].mxu1 }
 0x323   : > { %v571_v29 = vadd.f32 %v564_v25, %v803_v1  ;;  %v558_v30 = vpop.f32.mrb[3].mxu1 }
 0x324   : > { %v569_v31 = vadd.f32 %v556_v27, %v801_v0  ;;  %v559_v32 = vadd.f32 %v647_v23, %v558_v30 }
 0x325   : > { %574 = vst.msk [vmem:[%s278_s17 + $0x10] sm:$0x1] %vm292_vm1, %v571_v29 }
 0x326   : > { %572 = vst.msk [vmem:[%s278_s17] sm:$0xff] %vm285_vm0, %v569_v31  ;;  %v570_v33 = vadd.f32 %v559_v32, %v805_v2 }
 0x328   : > { %573 = vst.msk [vmem:[%s278_s17 + $0x8] sm:$0xff] %vm285_vm0, %v570_v33 }
 0x329 PF: > { %s17_s24 = sadd.s32 1, %s743_s24  }
 0x32a   : > { %p14_p4 = scmp.ge.s32.totalorder %s17_s24, 4  }
 0x32c   :  { %16 = sbr.rel (!%p14_p4) target bundleno = 1 (0x1), region = 78 }

// kernel: clip_image_encoder_forward.6
= control target key start
LH: loop header
LB: loop body
LE: loop exit
PB: predicated region body
PF: predicated region fallthrough
CT: control target
= control target key end

     0   :  { %s576_s24 = smov 0   ;;  %s633_s0 = inlined_call_operand.vmem [shape: f32[2,16,48], index: 0, kind: input, shape index: {}]   ;;  %s634_s1 = inlined_call_operand.vmem [shape: bf16[48,32], index: 1, kind: input, shape index: {}]   ;;  %s635_s2 = inlined_call_operand.vmem [shape: f32[1,32], index: 2, kind: input, shape index: {}]   ;;  %s636_s3 = inlined_call_operand.vmem [shape: f32[1,32], index: 3, kind: input, shape index: {}]   ;;  %s637_s4 = inlined_call_operand.vmem [shape: f32[16,32], index: 4, kind: input, shape index: {}]   ;;  %s638_s5 = inlined_call_operand.vmem [shape: f32[1,32], index: 5, kind: input, shape index: {}]   ;;  %s639_s6 = inlined_call_operand.vmem [shape: f32[1,32], index: 6, kind: input, shape index: {}]   ;;  %s640_s7 = inlined_call_operand.vmem [shape: f32[2,17,32], index: 7, kind: output, shape index: {}]  }
   0x1 LB: > { %s477_s25 = sadd.s32 4294967295, %s532_s24   ;;  %p481_p0 = scmp.ge.s32.totalorder %s532_s24, 1  ;;  %s532_s24 = sphi %s576_s24, %s17_s24  }
   0x2   : > { %p237_p1 = scmp.lt.s32.totalorder %s532_s24, 3 }
   0x4   : > { %p238_p2 = pnand %p481_p0, %p237_p1 }
   0x5   : > { %v517_v0 = vld [vmem:[%s634_s1] sm:$0xff] (!%p238_p2)   ;;  %v534_v1 = vmov (!%p238_p2), 0.0   ;;  %v518_v2 = vld [vmem:[%s634_s1 + $0x8] sm:$0xff] (!%p238_p2)   ;;  %vm535_vm0 = vmmov (!%p238_p2), 0   ;;  %p269_p3 = scmp.lt.s32.totalorder (!%p238_p2), %s477_s25, 1  ;;  %vm294_vm1 = vcmask (!%p238_p2), 253952   ;;  %v405_v47 = vlaneseq (!%p238_p2) }
   0x6   : > { %241 = sbr.rel (%p238_p2) target bundleno = 549 (0x225), region = 48  ;;  %496 = vmatprep.subr.bf16.mxu0 (!%p238_p2), %v534_v1  ;;  %502 = vmatprep.mubr.msk.bf16.mxu0 (!%p238_p2), %vm535_vm0, %v534_v1  ;;  %v291_v3 = vld [vmem:[%s635_s2] sm:$0x1] (!%p238_p2)  ;;  %v519_v6 = vld [vmem:[%s634_s1 + $0x10] sm:$0xff] (!%p238_p2)   ;;  %vm332_vm2 = vcmask (!%p238_p2), 392192   ;;  %v313_v16 = vld [vmem:[%s637_s4 + $0x8] sm:$0xff] (!%p238_p2) }
   0x7   : > { %497 = vmatpush3.bf16.msra.mxu0 (!%p238_p2), %v517_v0  ;;  %v292_v4 = vld [vmem:[%s636_s3] sm:$0x1] (!%p238_p2)  ;;  %vm377_vm3 = vcmask (!%p238_p2), 261120   ;;  %v406_v52 = vshrl.u32 (!%p238_p2), %v405_v47, 7 }
   0x8   : > { %498 = vmatprep.subr.bf16.mxu0 (!%p238_p2), %v534_v1  ;;  %v293_v5 = vadd.f32 (!%p238_p2), %v292_v4, %v291_v3  ;;  %v312_v13 = vld [vmem:[%s637_s4] sm:$0xff] (!%p238_p2) }
   0x9   : > { %v289_v40 = vld [vmem:[%s638_s5] sm:$0x1] (!%p238_p2)  ;;  %v407_v53 = vsub.s32 (!%p238_p2), 0, %v406_v52 }
   0xa   : > { %v295_v7 = vsel (!%p238_p2), %vm294_vm1, %v293_v5, 0.0  ;;  %v290_v42 = vld [vmem:[%s639_s6] sm:$0x1] (!%p238_p2) }
   0xb   : > { %499 = vmatpush3.bf16.msra.mxu0 (!%p238_p2), %v518_v2  ;;  %296 = vadd.xlane.f32.xlu0 (!%p238_p2), %v295_v7  ;;  %v408_v54 = vrot.slane (!%p238_p2), %v289_v40, %v407_v53  ;;  %v416_v56 = vrot.slane (!%p238_p2), %v290_v42, %v407_v53 }
   0xc   : > { %500 = vmatprep.subr.bf16.mxu0 (!%p238_p2), %v534_v1 }
   0xd   : > { %s642_s25 = smov (!%p269_p3, %s477_s25), 1 }
   0xe   : > { %s491_s13 = sshll.u32 %s642_s25, 4  ;;  %s506_s21 = smul.u32 24, %s642_s25 }
   0xf   : > { %s273_s16 = scalar_lea.vmem %s633_s0, %s491_s13  ;;  %501 = vmatpush3.bf16.msra.mxu0 %v519_v6 }
  0x10   : > { %v280_v8 = vld [vmem:[%s273_s16] sm:$0xff]  ;;  %v281_v9 = vld [vmem:[%s273_s16 + $0x8] sm:$0xff]  ;;  %s278_s30 = scalar_lea.vmem %s640_s7, %s506_s21 }
  0x11   : > { %v282_v10 = vpack.c.bf16 %v281_v9, %v280_v8 }
  0x13   : > { %503 = vmatmul.mubr.msk.bf16.vlgmr.msra.gmra.mrb[0].mxu0 %vm332_vm2, %v282_v10 }
  0x98   : > { %v297_v11 = vpop.xlane.xlu0 %296 }
  0x99   : > { %v299_v12 = vmul.f32 0.03125, %v297_v11 }
  0x9b   : > { %v300_v14 = vsub.f32 %v293_v5, %v299_v12 }
  0x9d   : > { %v301_v23 = vmul.f32 %v300_v14, %v300_v14 }
  0x9f   : > { %v302_v25 = vsel %vm294_vm1, %v301_v23, 0.0 }
  0xe6   : > { %v370_v15 = vpop.f32.mrb[0].mxu0 }
  0xe7   : > { %v371_v17 = vadd.f32 %v370_v15, %v312_v13  ;;  %v504_v18 = vpop.f32.mrb[1].mxu0 }
  0xe8   : > { %v373_v19 = vpop.f32.mrb[2].mxu0 }
  0xe9   : > { %v374_v20 = vadd.f32 %v373_v19, %v313_v16  ;;  %v505_v21 = vpop.f32.mrb[3].mxu0  ;;  %v378_v22 = vsel %vm377_vm3, %v371_v17, 0.0 }
  0xea   : > { %379 = vadd.xlane.f32.xlu0 %v378_v22 }
  0xeb   : > { %v381_v24 = vsel %vm377_vm3, %v374_v20, 0.0 }
  0xec   : > { %382 = vadd.xlane.f32.xlu1 %v381_v24 }
  0xf0   : > { %303 = vadd.xlane.f32.xlu1 %v302_v25 }
 0x177   : > { %v380_v26 = vpop.xlane.xlu0 %379 }
 0x178   : > { %v384_v27 = vmul.f32 0.03125, %v380_v26 }
 0x179   : > { %v383_v28 = vpop.xlane.xlu1 %382 }
 0x17a   : > { %v386_v29 = vsub.f32 %v371_v17, %v384_v27  ;;  %v385_v30 = vmul.f32 0.03125, %v383_v28 }
 0x17c   : > { %v387_v31 = vsub.f32 %v374_v20, %v385_v30  ;;  %v388_v32 = vmul.f32 %v386_v29, %v386_v29 }
 0x17d   : > { %v304_v33 = vpop.xlane.xlu1 %303 }
 0x17e   : > { %v305_v34 = vmul.f32 0.03125, %v304_v33  ;;  %v390_v35 = vsel %vm377_vm3, %v388_v32, 0.0  ;;  %v389_v36 = vmul.f32 %v387_v31, %v387_v31 }
 0x17f   : > { %391 = vadd.xlane.f32.xlu0 %v390_v35 }
 0x180   : > { %v306_v37 = vadd.f32 1e-05, %v305_v34  ;;  %v393_v38 = vsel %vm377_vm3, %v389_v36, 0.0 }
 0x181   : > { %394 = vadd.xlane.f32.xlu1 %v393_v38 }
 0x182   : > { %520 = vrsqrt.f32 %v306_v37 }
 0x18c   : > { %v521_v39 = vpop.eup %520 }
 0x18d   : > { %v308_v41 = vmul.f32 %v521_v39, %v300_v14 }
 0x18f   : > { %v309_v43 = vmul.f32 %v308_v41, %v289_v40 }
 0x191   : > { %v310_v44 = vadd.f32 %v309_v43, %v290_v42 }
 0x193   : > { %311 = vst.msk [vmem:[%s278_s30] sm:$0x1] %vm294_vm1, %v310_v44 }
 0x20c   : > { %v392_v45 = vpop.xlane.xlu0 %391 }
 0x20d   : > { %v396_v46 = vmul.f32 0.03125, %v392_v45 }
 0x20e   : > { %v395_v48 = vpop.xlane.xlu1 %394 }
 0x20f   : > { %v398_v49 = vadd.f32 1e-05, %v396_v46  ;;  %v397_v50 = vmul.f32 0.03125, %v395_v48 }
 0x211   : > { %522 = vrsqrt.f32 %v398_v49  ;;  %v399_v51 = vadd.f32 1e-05, %v397_v50 }
 0x213   : > { %524 = vrsqrt.f32 %v399_v51 }
 0x21b   : > { %v523_v55 = vpop.eup %522 }
 0x21c   : > { %v402_v57 = vmul.f32 %v523_v55, %v386_v29 }
 0x21d   : > { %v525_v58 = vpop.eup %524 }
 0x21e   : > { %v410_v59 = vmul.f32 %v408_v54, %v402_v57  ;;  %v403_v60 = vmul.f32 %v525_v58, %v387_v31 }
 0x220   : > { %v418_v61 = vadd.f32 %v416_v56, %v410_v59  ;;  %v411_v62 = vmul.f32 %v408_v54, %v403_v60 }
 0x222   : > { %420 = vst.msk [vmem:[%s278_s30 + $0x1] sm:$0xff] %vm377_vm3, %v418_v61  ;;  %v419_v63 = vadd.f32 %v416_v56, %v411_v62 }
 0x224   : > { %421 = vst.msk [vmem:[%s278_s30 + $0x9] sm:$0xff] %vm377_vm3, %v419_v63 }
 0x225 PF: > { %s17_s24 = sadd.s32 1, %s532_s24  }
 0x226   : > { %p14_p4 = scmp.ge.s32.totalorder %s17_s24, 4  }
 0x228   :  { %16 = sbr.rel (!%p14_p4) target bundleno = 1 (0x1), region = 78 }

// kernel: clip_image_encoder_forward.11
= control target key start
LH: loop header
LB: loop body
LE: loop exit
PB: predicated region body
PF: predicated region fallthrough
CT: control target
= control target key end

     0   :  { %vm28_vm0 = vcmask 254976   ;;  %s324_s0 = inlined_call_operand.vmem [shape: f32[2,32], index: 0, kind: input, shape index: {}]   ;;  %s325_s1 = inlined_call_operand.vmem [shape: f32[1,32], index: 1, kind: input, shape index: {}]   ;;  %s326_s2 = inlined_call_operand.vmem [shape: f32[1,32], index: 2, kind: input, shape index: {}]   ;;  %s327_s3 = inlined_call_operand.vmem [shape: bf16[32,16], index: 3, kind: input, shape index: {}]   ;;  %s328_s4 = inlined_call_operand.vmem [shape: bf16[16,10], index: 4, kind: input, shape index: {}]   ;;  %s329_s5 = inlined_call_operand.vmem [shape: f32[1,10], index: 5, kind: input, shape index: {}]   ;;  %s330_s6 = inlined_call_operand.hbm [shape: f32[2,10], index: 6, kind: output, shape index: {}]  }
   0x1   :  { %v25_v0 = vld [vmem:[%s324_s0] sm:$0x3] }
   0x2   :  { %v29_v1 = vsel %vm28_vm0, %v25_v0, 0.0 }
   0x3   :  { %30 = vadd.xlane.f32.xlu0 %v29_v1 }
   0x4   :  { %11 = vsyncpa [#allocation3], 0  ;;  %v224_v7 = vld [vmem:[%s327_s3] sm:$0xff]   ;;  %v253_v8 = vmov 0.0   ;;  %v225_v9 = vld [vmem:[%s327_s3 + $0x8] sm:$0xff]   ;;  %vm254_vm1 = vmmov 0  }
   0x5   :  { %207 = vmatprep.subr.bf16.mxu0 %v253_v8  ;;  %215 = vmatprep.subr.bf16.mxu1 %v253_v8  ;;  %v194_v14 = vld [vmem:[%s325_s1] ss:$0 sm:$0xff]  ;;  %vm74_vm2 = vcmask 261120   ;;  %vm134_vm3 = vcmask 130048   ;;  %vm178_vm4 = vcmask 74752  }
   0x6   :  { %208 = vmatpush3.bf16.msra.mxu0 %v224_v7  ;;  %211 = vmatprep.mubr.msk.bf16.mxu0 %vm254_vm1, %v253_v8  ;;  %v195_v16 = vld [vmem:[%s326_s2] ss:$0 sm:$0xff]  ;;  %s255_s2 = smov [#allocation2]  }
   0x7   :  { %209 = vmatprep.subr.bf16.mxu0 %v253_v8  ;;  %217 = vmatprep.mubr.msk.bf16.mxu1 %vm254_vm1, %v253_v8  ;;  %v226_v20 = vld [vmem:[%s328_s4] sm:$0xff]   ;;  %s186_s8 = sshll.u32 %s255_s2, 4  ;;  %s187_s8 = int_to_ptr.vmem [resolvable:$true] %s186_s8 }
   0x8   :  { %216 = vmatpush3.bf16.msra.mxu1 %v226_v20  ;;  %v199_v26 = vld [vmem:[%s329_s5] ss:$0 sm:$0xff]  ;;  %s229_s4 = scalar_lea.vmem %s187_s8, 32  ;;  %p234_p1 = scmp.lt.s32.totalorder %s187_s8, %s187_s8 }
   0x9   :  { %p230_p0 = scmp.ne.s32.totalorder %s187_s8, %s229_s4  ;;  %p235_p2 = scmp.lt.s32.totalorder %s229_s4, %s229_s4 }
   0xa   :  { %210 = vmatpush3.bf16.msra.mxu0 %v225_v9 }
   0xb   :  { %p236_p3 = por %p235_p2, %p234_p1 }
   0xd   :  { %p237_p4 = pnand %p236_p3, %p230_p0 }
  0x90   :  { %v31_v2 = vpop.xlane.xlu0 %30 }
  0x91   :  { %v33_v3 = vmul.f32 0.03125, %v31_v2 }
  0x93   :  { %v34_v4 = vsub.f32 %v25_v0, %v33_v3 }
  0x95   :  { %v35_v5 = vmul.f32 %v34_v4, %v34_v4 }
  0x97   :  { %v36_v6 = vsel %vm28_vm0, %v35_v5, 0.0 }
  0x98   :  { %37 = vadd.xlane.f32.xlu0 %v36_v6 }
 0x125   :  { %v38_v10 = vpop.xlane.xlu0 %37 }
 0x126   :  { %v39_v11 = vmul.f32 0.03125, %v38_v10 }
 0x128   :  { %v40_v12 = vadd.f32 1e-05, %v39_v11 }
 0x12a   :  { %227 = vrsqrt.f32 %v40_v12 }
 0x134   :  { %v228_v13 = vpop.eup %227 }
 0x135   :  { %v42_v15 = vmul.f32 %v228_v13, %v34_v4 }
 0x137   :  { %v49_v17 = vmul.f32 %v194_v14, %v42_v15 }
 0x139   :  { %v56_v18 = vadd.f32 %v195_v16, %v49_v17 }
 0x13b   :  { %v57_v19 = vpack.c.bf16 %v56_v18, %v56_v18 }
 0x13d   :  { %212 = vmatmul.mubr.msk.bf16.vlgmr.msra.gmra.mrb[0].mxu0 %vm74_vm2, %v57_v19 }
 0x210   :  { %v112_v21 = vpop.f32.mrb[0].mxu0 }
 0x211   :  { %v118_v22 = vpack.c.bf16 %v112_v21, %v112_v21  ;;  %v213_v23 = vpop.f32.mrb[1].mxu0 }
 0x212   :  { %v115_v24 = vpop.f32.mrb[2].mxu0 }
 0x213   :  { %v214_v25 = vpop.f32.mrb[3].mxu0  ;;  %218 = vmatmul.mubr.msk.bf16.vlgmr.msra.gmra.mrb[0].mxu1 %vm134_vm3, %v118_v22 }
 0x2e6   :  { %v172_v27 = vpop.f32.mrb[0].mxu1 }
 0x2e7   :  { %v173_v28 = vadd.f32 %v199_v26, %v172_v27  ;;  %v219_v29 = vpop.f32.mrb[1].mxu1 }
 0x2e8   :  { %v175_v30 = vpop.f32.mrb[2].mxu1 }
 0x2e9   :  { %v220_v31 = vpop.f32.mrb[3].mxu1  ;;  %179 = vst.msk [vmem:[#allocation2] sm:$0x3] %vm178_vm4, %v173_v28 }
 0x2ea   :  { %240 = shalt.err (!%p237_p4)
}
 0x2eb   :  { %s241_s5 = scalar_lea.hbm %s330_s6, 32 }
 0x2ec   :  { %p242_p5 = scmp.ne.s32.totalorder %s330_s6, %s241_s5  ;;  %p245_p6 = scmp.lt.u32.totalorder %s241_s5, %s330_s6 }
 0x2ee   :  { %p247_p7 = pnand %p245_p6, %p242_p5 }
 0x2f0   :  { %250 = shalt.err (!%p247_p7)
}
 0x2f1   :  { %189 = dma.vmem_to_hbm [thread:$0]  %s187_s8, 32, %s330_s6, [#allocation3]  }
 0x2f2   :  { %251 = dma.done.wait [#allocation3], 32  }
 0x2f3   :  { %252 = vsyncadd [#allocation3], 4294967264 }
 0x2f4   :  { %193 = vsyncpa [#allocation3], 1 }

// kernel: clip_image_encoder_forward.7
= control target key start
LH: loop header
LB: loop body
LE: loop exit
PB: predicated region body
PF: predicated region fallthrough
CT: control target
= control target key end

     0   :  { %s2780_s24 = smov 0   ;;  %s3120_s0 = inlined_call_operand.vmem [shape: f32[2,17,32], index: 0, kind: input, shape index: {}]   ;;  %s3121_s1 = inlined_call_operand.vmem [shape: f32[1,32], index: 1, kind: input, shape index: {}]   ;;  %s3122_s2 = inlined_call_operand.vmem [shape: f32[1,32], index: 2, kind: input, shape index: {}]   ;;  %s3123_s3 = inlined_call_operand.vmem [shape: bf16[12,32,8], index: 3, kind: input, shape index: {}]   ;;  %s3124_s4 = inlined_call_operand.vmem [shape: f32[12,1,8], index: 4, kind: input, shape index: {}]   ;;  %s3125_s5 = inlined_call_operand.vmem [shape: bf16[4,8,32], index: 5, kind: input, shape index: {}]   ;;  %s3126_s6 = inlined_call_operand.vmem [shape: f32[1,32], index: 6, kind: input, shape index: {}]   ;;  %s3127_s7 = inlined_call_operand.vmem [shape: f32[2,17,32], index: 7, kind: output, shape index: {}]  }
   0x1 LB: > { %s2198_s25 = sadd.s32 4294967295, %s2737_s24   ;;  %p2202_p0 = scmp.ge.s32.totalorder %s2737_s24, 1  ;;  %s2737_s24 = sphi %s2780_s24, %s17_s24  }
   0x2   : > { %p237_p1 = scmp.lt.s32.totalorder %s2737_s24, 3 }
   0x4   : > { %p238_p2 = pnand %p2202_p0, %p237_p1 }
   0x5   : > { %p269_p3 = scmp.lt.s32.totalorder (!%p238_p2), %s2198_s25, 1  ;;  %vm285_vm0 = vcmask (!%p238_p2), 261120   ;;  %vm292_vm1 = vcmask (!%p238_p2), 253952   ;;  %v2650_v21 = vld [vmem:[%s3123_s3] sm:$0xff] (!%p238_p2)   ;;  %v2652_v23 = vld [vmem:[%s3123_s3 + $0x8] sm:$0xff] (!%p238_p2)   ;;  %vm574_vm2 = vcmask (!%p238_p2), 64512  }
   0x6   : > { %241 = sbr.rel (%p238_p2) target bundleno = 4289 (0x10c1), region = 48  ;;  %v2651_v22 = vld [vmem:[%s3123_s3 + $0x40] sm:$0xff] (!%p238_p2)   ;;  %2444 = vmatprep.subr.bf16.mxu0 (!%p238_p2), %v2650_v21  ;;  %v2653_v24 = vld [vmem:[%s3123_s3 + $0x48] sm:$0xff] (!%p238_p2)   ;;  %vm683_vm3 = vcmask (!%p238_p2), 1040384   ;;  %vm638_vm4 = vcmask (!%p238_p2), 138240   ;;  %vm645_vm5 = vcmask (!%p238_p2), 131072  }
   0x7   : > { %2452 = vmatprep.subr.bf16.mxu1 (!%p238_p2), %v2651_v22  ;;  %2445 = vmatpush3.bf16.msra.mxu0 (!%p238_p2), %v2650_v21  ;;  %v2654_v25 = vld [vmem:[%s3123_s3 + $0x80] sm:$0xff] (!%p238_p2)   ;;  %v2655_v51 = vld [vmem:[%s3123_s3 + $0x88] sm:$0xff] (!%p238_p2)   ;;  %vm1130_vm6 = vcmask (!%p238_p2), 1043456  }
   0x8   : > { %2453 = vmatpush3.bf16.msra.mxu1 (!%p238_p2), %v2651_v22  ;;  %2446 = vmatprep.subr.bf16.mxu0 (!%p238_p2), %v2652_v23  ;;  %v2205_v37 = vld [vmem:[%s3121_s1] ss:$0 sm:$0xff] (!%p238_p2)  ;;  %v2217_v54 = vld [vmem:[%s3124_s4 + $0x4] ss:$0 sm:$0xff] (!%p238_p2) }
   0x9   : > { %2454 = vmatprep.subr.bf16.mxu1 (!%p238_p2), %v2653_v24  ;;  %v2206_v43 = vld [vmem:[%s3122_s2] ss:$0 sm:$0xff] (!%p238_p2) }
   0xa   : > { %v2207_v55 = vld [vmem:[%s3124_s4] ss:$0 sm:$0xff] (!%p238_p2) }
   0xb   : > { %2447 = vmatpush3.bf16.msra.mxu0 (!%p238_p2), %v2652_v23 }
   0xc   : > { %2455 = vmatpush3.bf16.msra.mxu1 (!%p238_p2), %v2653_v24  ;;  %2460 = vmatprep.subr.bf16.mxu0 (!%p238_p2), %v2654_v25  ;;  %v2657_v24 = vld [vmem:[%s3123_s3 + $0x58] sm:$0xff] (!%p238_p2)  }
   0xd   : > { %s3129_s25 = smov (!%p269_p3, %s2198_s25), 1 }
   0xe   : > { %s2640_s26 = smul.u32 24, %s3129_s25 }
  0x10   : > { %s2796_s29 = scalar_lea.vmem %s3120_s0, %s2640_s26  ;;  %s278_s19 = scalar_lea.vmem %s3127_s7, %s2640_s26 }
  0x11   : > { %v280_v0 = vld [vmem:[%s2796_s29] sm:$0xff]  ;;  %v282_v1 = vld [vmem:[%s2796_s29 + $0x10] sm:$0x1]  ;;  %v281_v2 = vld [vmem:[%s2796_s29 + $0x8] sm:$0xff] }
  0x12   : > { %v286_v3 = vsel %vm285_vm0, %v280_v0, 0.0  ;;  %v293_v4 = vsel %vm292_vm1, %v282_v1, 0.0  ;;  %v289_v5 = vsel %vm285_vm0, %v281_v2, 0.0 }
  0x13   : > { %287 = vadd.xlane.f32.xlu0 %v286_v3  ;;  %294 = vadd.xlane.f32.xlu1 %v293_v4 }
  0x17   : > { %290 = vadd.xlane.f32.xlu0 %v289_v5  ;;  %v2227_v5 = vld [vmem:[%s3124_s4 + $0x8] ss:$0 sm:$0xff] }
  0xa0   : > { %v288_v6 = vpop.xlane.xlu0 %287  ;;  %v295_v7 = vpop.xlane.xlu1 %294 }
  0xa1   : > { %v297_v8 = vmul.f32 0.03125, %v288_v6  ;;  %v299_v9 = vmul.f32 0.03125, %v295_v7 }
  0xa3   : > { %v300_v10 = vsub.f32 %v280_v0, %v297_v8  ;;  %v302_v11 = vsub.f32 %v282_v1, %v299_v9 }
  0xa4   : > { %v291_v12 = vpop.xlane.xlu0 %290 }
  0xa5   : > { %v298_v13 = vmul.f32 0.03125, %v291_v12  ;;  %v303_v14 = vmul.f32 %v300_v10, %v300_v10  ;;  %v305_v15 = vmul.f32 %v302_v11, %v302_v11 }
  0xa7   : > { %v301_v16 = vsub.f32 %v281_v2, %v298_v13  ;;  %v306_v17 = vsel %vm285_vm0, %v303_v14, 0.0  ;;  %v312_v18 = vsel %vm292_vm1, %v305_v15, 0.0 }
  0xa8   : > { %307 = vadd.xlane.f32.xlu1 %v306_v17 }
  0xa9   : > { %v304_v19 = vmul.f32 %v301_v16, %v301_v16 }
  0xab   : > { %v309_v20 = vsel %vm285_vm0, %v304_v19, 0.0  ;;  %v2656_v19 = vld [vmem:[%s3123_s3 + $0x50] sm:$0xff]  }
  0xac   : > { %313 = vadd.xlane.f32.xlu1 %v312_v18  ;;  %310 = vadd.xlane.f32.xlu0 %v309_v20 }
 0x135   : > { %v308_v26 = vpop.xlane.xlu1 %307 }
 0x136   : > { %v315_v27 = vmul.f32 0.03125, %v308_v26 }
 0x138   : > { %v318_v28 = vadd.f32 1e-05, %v315_v27 }
 0x139   : > { %v314_v29 = vpop.xlane.xlu1 %313  ;;  %v311_v30 = vpop.xlane.xlu0 %310 }
 0x13a   : > { %2674 = vrsqrt.f32 %v318_v28  ;;  %v317_v31 = vmul.f32 0.03125, %v314_v29  ;;  %v316_v32 = vmul.f32 0.03125, %v311_v30 }
 0x13c   : > { %v320_v33 = vadd.f32 1e-05, %v317_v31  ;;  %v319_v34 = vadd.f32 1e-05, %v316_v32 }
 0x13e   : > { %2676 = vrsqrt.f32 %v320_v33 }
 0x13f   : > { %2678 = vrsqrt.f32 %v319_v34 }
 0x144   : > { %v2675_v35 = vpop.eup %2674 }
 0x145   : > { %v324_v36 = vmul.f32 %v2675_v35, %v300_v10 }
 0x147   : > { %v333_v41 = vmul.f32 %v2205_v37, %v324_v36  ;;  %v2251_v36 = vld [vmem:[%s3124_s4 + $0x5] ss:$0 sm:$0xff] }
 0x148   : > { %v2677_v38 = vpop.eup %2676 }
 0x149   : > { %v2679_v39 = vpop.eup %2678  ;;  %v326_v40 = vmul.f32 %v2677_v38, %v302_v11  ;;  %v342_v47 = vadd.f32 %v2206_v43, %v333_v41 }
 0x14a   : > { %v325_v42 = vmul.f32 %v2679_v39, %v301_v16  ;;  %v2739_v16 = vmov 0  }
 0x14b   : > { %v335_v44 = vmul.f32 %v2205_v37, %v326_v40  ;;  %v2860_v17 = vsel %vm683_vm3, 65535, %v2739_v16 }
 0x14c   : > { %v334_v45 = vmul.f32 %v2205_v37, %v325_v42 }
 0x14d   : > { %v344_v46 = vadd.f32 %v2206_v43, %v335_v44 }
 0x14e   : > { %v343_v48 = vadd.f32 %v2206_v43, %v334_v45 }
 0x14f   : > { %v2828_v49 = vpack.c.bf16 %v344_v46, %v344_v46 }
 0x150   : > { %v2830_v50 = vpack.c.bf16 %v343_v48, %v342_v47 }
 0x152   : > { %2448 = vmatprep.mubr.msk.bf16.mxu0 %vm285_vm0, %v2830_v50  ;;  %2456 = vmatprep.mubr.msk.bf16.mxu1 %vm285_vm0, %v2830_v50 }
 0x153   : > { %2449 = vmatmul.mubr.msk.bf16.vlgmr.msra.gmra.mrb[0].mxu0 %vm285_vm0, %v2828_v49  ;;  %2457 = vmatmul.mubr.msk.bf16.vlgmr.msra.gmra.mrb[0].mxu1 %vm285_vm0, %v2828_v49 }
 0x154   : > { %2461 = vmatpush3.bf16.msra.mxu0 %v2654_v25  ;;  %2464 = vmatprep.mubr.msk.bf16.mxu0 %vm285_vm0, %v2830_v50 }
 0x155   : > { %2462 = vmatprep.subr.bf16.mxu0 %v2655_v51 }
 0x158   : > { %2463 = vmatpush3.bf16.msra.mxu0 %v2655_v51 }
 0x15b   : > { %2465 = vmatmul.mubr.msk.bf16.vlgmr.msra.gmra.mrb[4].mxu0 %vm285_vm0, %v2828_v49 }
 0x226   : > { %v2450_v52 = vpop.f32.mrb[0].mxu0  ;;  %v2458_v53 = vpop.f32.mrb[0].mxu1 }
 0x227   : > { %v410_v56 = vpop.f32.mrb[1].mxu0  ;;  %v483_v57 = vpop.f32.mrb[1].mxu1  ;;  %v492_v60 = vadd.f32 %v2458_v53, %v2217_v54  ;;  %v419_v22 = vadd.f32 %v2450_v52, %v2207_v55 }
 0x228   : > { %v2451_v58 = vpop.f32.mrb[2].mxu0  ;;  %v2459_v59 = vpop.f32.mrb[2].mxu1  ;;  %v411_v63 = vadd.f32 %v2207_v55, %v410_v56  ;;  %v484_v0 = vadd.f32 %v2217_v54, %v483_v57 }
 0x229   : > { %v413_v61 = vpop.f32.mrb[3].mxu0  ;;  %v486_v62 = vpop.f32.mrb[3].mxu1  ;;  %v573_v6 = vpack.c.bf16 %v492_v60, %v492_v60  ;;  %v571_v23 = vpack.c.bf16 %v419_v22, %v419_v22 }
 0x22a   : > { %v414_v1 = vadd.f32 %v2207_v55, %v413_v61  ;;  %v487_v2 = vadd.f32 %v2217_v54, %v486_v62 }
 0x22b   : > { %v585_v20 = vsel %vm574_vm2, %v573_v6, 0 }
 0x22c   : > { %v570_v3 = vpack.c.bf16 %v414_v1, %v411_v63  ;;  %v572_v4 = vpack.c.bf16 %v487_v2, %v484_v0  ;;  %v2658_v0 = vld [vmem:[%s3123_s3 + $0x10] sm:$0xff]  }
 0x22e   : > { %v2466_v7 = vpop.f32.mrb[4].mxu0  ;;  %2628 = vmatprep.subr.msk.bf16.mxu1 %vm574_vm2, %v572_v4  ;;  %2472 = vmatprep.mubr.msk.bf16.mxu1 %vm574_vm2, %v570_v3  ;;  %v582_v8 = vsel %vm574_vm2, %v572_v4, 0 }
 0x22f   : > { %v565_v9 = vadd.f32 %v2466_v7, %v2227_v5  ;;  %v556_v10 = vpop.f32.mrb[5].mxu0  ;;  %2469 = vmatpush3.bf16.xpose.msra.mxu1 %v582_v8 }
 0x230   : > { %v2467_v11 = vpop.f32.mrb[6].mxu0  ;;  %2629 = vmatprep.subr.msk.bf16.mxu1 %vm574_vm2, %v573_v6  ;;  %v557_v14 = vadd.f32 %v2227_v5, %v556_v10 }
 0x231   : > { %v559_v12 = vpop.f32.mrb[7].mxu0  ;;  %v676_v13 = vpack.c.bf16 %v565_v9, %v565_v9 }
 0x232   : > { %v560_v15 = vadd.f32 %v2227_v5, %v559_v12  ;;  %v2659_v12 = vld [vmem:[%s3123_s3 + $0x18] sm:$0xff]  }
 0x233   : > { %v687_v21 = vand.u32 %v2860_v17, %v676_v13  ;;  %v2660_v13 = vld [vmem:[%s3123_s3 + $0x90] sm:$0xff]  }
 0x234   : > { %v675_v18 = vpack.c.bf16 %v560_v15, %v557_v14  ;;  %v2661_v14 = vld [vmem:[%s3123_s3 + $0x98] sm:$0xff]   ;;  %v739_v15 = vld [vmem:[%s3125_s5] sm:$0xf] }
 0x236   : > { %2476 = vmatprep.subr.bf16.mxu0 %v675_v18 }
 0x237   : > { %2471 = vmatpush3.bf16.xpose.msra.mxu1 %v585_v20  ;;  %2477 = vmatpush3.bf16.msra.mxu0 %v675_v18 }
 0x238   : > { %2478 = vmatprep.subr.bf16.mxu0 %v687_v21  ;;  %2492 = vmatprep.subr.bf16.mxu1 %v2656_v19 }
 0x23b   : > { %2479 = vmatpush3.bf16.msra.mxu0 %v687_v21 }
 0x23c   : > { %2484 = vmatprep.subr.bf16.mxu0 %v2658_v0 }
 0x23e   : > { %2473 = vmatmul.mubr.msk.bf16.vlgmr.msra.gmra.mrb[4].mxu1 %vm574_vm2, %v571_v23  ;;  %v2241_v23 = vld [vmem:[%s3124_s4 + $0x1] ss:$0 sm:$0xff] }
 0x23f   : > { %2493 = vmatpush3.bf16.msra.mxu1 %v2656_v19  ;;  %2496 = vmatprep.mubr.msk.bf16.mxu1 %vm285_vm0, %v2830_v50 }
 0x240   : > { %2494 = vmatprep.subr.bf16.mxu1 %v2657_v24 }
 0x243   : > { %2495 = vmatpush3.bf16.msra.mxu1 %v2657_v24 }
 0x246   : > { %2497 = vmatmul.mubr.msk.bf16.vlgmr.msra.gmra.mrb[8].mxu1 %vm285_vm0, %v2828_v49 }
 0x311   : > { %v2474_v25 = vpop.f32.mrb[4].mxu1 }
 0x312   : > { %v621_v26 = vpop.f32.mrb[5].mxu1  ;;  %v637_v30 = vmul.f32 0.35355338, %v2474_v25 }
 0x313   : > { %v635_v27 = vmul.f32 0.35355338, %v621_v26  ;;  %v2475_v28 = vpop.f32.mrb[6].mxu1 }
 0x314   : > { %v624_v29 = vpop.f32.mrb[7].mxu1  ;;  %v646_v35 = vsel %vm645_vm5, %v637_v30, -inf }
 0x315   : > { %v636_v31 = vmul.f32 0.35355338, %v624_v29  ;;  %v639_v32 = vsel %vm638_vm4, %v635_v27, -inf }
 0x316   : > { %640 = vmax.xlane.f32.xlu0 %v639_v32 }
 0x317   : > { %v642_v33 = vsel %vm638_vm4, %v636_v31, -inf }
 0x318   : > { %643 = vmax.xlane.f32.xlu1 %v642_v33  ;;  %v1189_v33 = vsel %vm1130_vm6, %v739_v15, 0 }
 0x319   : > { %v2498_v34 = vpop.f32.mrb[8].mxu1 }
 0x31a   : > { %647 = vmax.xlane.f32.xlu0 %v646_v35  ;;  %v872_v37 = vpop.f32.mrb[9].mxu1  ;;  %v881_v40 = vadd.f32 %v2498_v34, %v2251_v36  ;;  %v2662_v34 = vld [vmem:[%s3123_s3 + $0x60] sm:$0xff]  }
 0x31b   : > { %v2499_v38 = vpop.f32.mrb[10].mxu1  ;;  %v873_v41 = vadd.f32 %v2251_v36, %v872_v37 }
 0x31c   : > { %v875_v39 = vpop.f32.mrb[11].mxu1  ;;  %v962_v44 = vpack.c.bf16 %v881_v40, %v881_v40 }
 0x31d   : > { %v876_v42 = vadd.f32 %v2251_v36, %v875_v39 }
 0x31e   : > { %v973_v46 = vsel %vm574_vm2, %v962_v44, 0 }
 0x31f   : > { %v961_v43 = vpack.c.bf16 %v876_v42, %v873_v41 }
 0x321   : > { %2630 = vmatprep.subr.msk.bf16.mxu1 %vm574_vm2, %v961_v43  ;;  %v970_v45 = vsel %vm574_vm2, %v961_v43, 0 }
 0x322   : > { %2509 = vmatpush3.bf16.xpose.msra.mxu1 %v970_v45  ;;  %v2663_v45 = vld [vmem:[%s3123_s3 + $0x68] sm:$0xff]  }
 0x323   : > { %2631 = vmatprep.subr.msk.bf16.mxu1 %vm574_vm2, %v962_v44 }
 0x32a   : > { %2511 = vmatpush3.bf16.xpose.msra.mxu1 %v973_v46 }
 0x32b   : > { %2633 = vmatprep.subr.msk.bf16.mxu1 %vm1130_vm6, %v739_v15 }
 0x3a3   : > { %v641_v47 = vpop.xlane.xlu0 %640 }
 0x3a4   : > { %v649_v48 = vsub.f32 %v635_v27, %v641_v47 }
 0x3a5   : > { %v644_v51 = vpop.xlane.xlu1 %643 }
 0x3a6   : > { %v652_v52 = vmul.f32 1.442695, %v649_v48  ;;  %v650_v53 = vsub.f32 %v636_v31, %v644_v51  ;;  %v2261_v31 = vld [vmem:[%s3124_s4 + $0x9] ss:$0 sm:$0xff] }
 0x3a7   : > { %v648_v54 = vpop.xlane.xlu0 %647 }
 0x3a8   : > { %2680 = vpow2.f32 %v652_v52  ;;  %v654_v55 = vmul.f32 1.442695, %v650_v53  ;;  %v651_v56 = vsub.f32 %v637_v30, %v648_v54 }
 0x3aa   : > { %2682 = vpow2.f32 %v654_v55  ;;  %v656_v57 = vmul.f32 1.442695, %v651_v56 }
 0x3ac   : > { %2684 = vpow2.f32 %v656_v57 }
 0x3b2   : > { %v2681_v58 = vpop.eup %2680 }
 0x3b3   : > { %v658_v59 = vsel %vm638_vm4, %v2681_v58, 0.0 }
 0x3b4   : > { %v2683_v60 = vpop.eup %2682  ;;  %659 = vadd.xlane.f32.xlu1 %v658_v59 }
 0x3b5   : > { %v661_v61 = vsel %vm638_vm4, %v2683_v60, 0.0 }
 0x3b6   : > { %v2685_v62 = vpop.eup %2684  ;;  %662 = vadd.xlane.f32.xlu0 %v661_v61 }
 0x3b7   : > { %v664_v63 = vsel %vm645_vm5, %v2685_v62, 0.0 }
 0x3b8   : > { %665 = vadd.xlane.f32.xlu1 %v664_v63 }
 0x441   : > { %v660_v1 = vpop.xlane.xlu1 %659 }
 0x442   : > { %2686 = vrcp.f32 %v660_v1 }
 0x443   : > { %v663_v2 = vpop.xlane.xlu0 %662 }
 0x444   : > { %2688 = vrcp.f32 %v663_v2 }
 0x445   : > { %v666_v3 = vpop.xlane.xlu1 %665 }
 0x446   : > { %2690 = vrcp.f32 %v666_v3 }
 0x44c   : > { %v2687_v4 = vpop.eup %2686 }
 0x44d   : > { %v670_v6 = vmul.f32 %v2687_v4, %v2681_v58 }
 0x44e   : > { %v2689_v5 = vpop.eup %2688 }
 0x44f   : > { %v671_v7 = vmul.f32 %v2689_v5, %v2683_v60 }
 0x450   : > { %v2691_v8 = vpop.eup %2690 }
 0x451   : > { %v672_v9 = vmul.f32 %v2691_v8, %v2685_v62  ;;  %v673_v10 = vpack.c.bf16 %v671_v7, %v670_v6 }
 0x453   : > { %2480 = vmatprep.mubr.msk.bf16.mxu0 %vm638_vm4, %v673_v10  ;;  %v674_v11 = vpack.c.bf16 %v672_v9, %v672_v9 }
 0x455   : > { %2481 = vmatmul.mubr.msk.bf16.vlgmr.msra.gmra.mrb[8].mxu0 %vm638_vm4, %v674_v11 }
 0x456   : > { %2485 = vmatpush3.bf16.msra.mxu0 %v2658_v0  ;;  %2488 = vmatprep.mubr.msk.bf16.mxu0 %vm285_vm0, %v2830_v50  ;;  %v2290_v0 = vld [vmem:[%s3124_s4 + $0x6] ss:$0 sm:$0xff] }
 0x457   : > { %2486 = vmatprep.subr.bf16.mxu0 %v2659_v12 }
 0x45a   : > { %2487 = vmatpush3.bf16.msra.mxu0 %v2659_v12 }
 0x45b   : > { %2500 = vmatprep.subr.bf16.mxu0 %v2660_v13 }
 0x45d   : > { %2489 = vmatmul.mubr.msk.bf16.vlgmr.msra.gmra.mrb[12].mxu0 %vm285_vm0, %v2828_v49 }
 0x45e   : > { %2501 = vmatpush3.bf16.msra.mxu0 %v2660_v13  ;;  %2504 = vmatprep.mubr.msk.bf16.mxu0 %vm285_vm0, %v2830_v50 }
 0x45f   : > { %2502 = vmatprep.subr.bf16.mxu0 %v2661_v14 }
 0x462   : > { %2503 = vmatpush3.bf16.msra.mxu0 %v2661_v14 }
 0x465   : > { %2505 = vmatmul.mubr.msk.bf16.vlgmr.msra.gmra.mrb[16].mxu0 %vm285_vm0, %v2828_v49 }
 0x528   : > { %v2482_v16 = vpop.f32.mrb[8].mxu0 }
 0x529   : > { %v723_v18 = vpop.f32.mrb[9].mxu0  ;;  %v738_v44 = vpack.c.bf16 %v2482_v16, %v2482_v16 }
 0x52a   : > { %v2483_v19 = vpop.f32.mrb[10].mxu0 }
 0x52b   : > { %v726_v20 = vpop.f32.mrb[11].mxu0 }
 0x52c   : > { %v737_v21 = vpack.c.bf16 %v726_v20, %v723_v18 }
 0x530   : > { %v2490_v22 = vpop.f32.mrb[12].mxu0 }
 0x531   : > { %v799_v24 = vpop.f32.mrb[13].mxu0  ;;  %v808_v26 = vadd.f32 %v2490_v22, %v2241_v23 }
 0x532   : > { %v2491_v25 = vpop.f32.mrb[14].mxu0  ;;  %v800_v28 = vadd.f32 %v2241_v23, %v799_v24 }
 0x533   : > { %v802_v27 = vpop.f32.mrb[15].mxu0  ;;  %v960_v32 = vpack.c.bf16 %v808_v26, %v808_v26 }
 0x534   : > { %v803_v29 = vadd.f32 %v2241_v23, %v802_v27  ;;  %v2270_v27 = vld [vmem:[%s3125_s5 + $0x4] sm:$0xf] }
 0x536   : > { %v959_v30 = vpack.c.bf16 %v803_v29, %v800_v28 }
 0x538   : > { %v2506_v35 = vpop.f32.mrb[16].mxu0  ;;  %2512 = vmatprep.mubr.msk.bf16.mxu1 %vm574_vm2, %v959_v30 }
 0x539   : > { %v954_v36 = vadd.f32 %v2506_v35, %v2261_v31  ;;  %v945_v37 = vpop.f32.mrb[17].mxu0  ;;  %2513 = vmatmul.mubr.msk.bf16.vlgmr.msra.gmra.mrb[12].mxu1 %vm574_vm2, %v960_v32 }
 0x53a   : > { %v2507_v38 = vpop.f32.mrb[18].mxu0  ;;  %2532 = vmatprep.mubr.msk.bf16.mxu1 %vm574_vm2, %v737_v21  ;;  %2531 = vmatpush3.bf16.msra.mxu1 %v1189_v33  ;;  %v946_v41 = vadd.f32 %v2261_v31, %v945_v37 }
 0x53b   : > { %v948_v39 = vpop.f32.mrb[19].mxu0  ;;  %2544 = vmatprep.subr.bf16.mxu1 %v2662_v34  ;;  %v1062_v40 = vpack.c.bf16 %v954_v36, %v954_v36 }
 0x53c   : > { %v949_v42 = vadd.f32 %v2261_v31, %v948_v39  ;;  %v1132_v39 = vsel %vm1130_vm6, %v2270_v27, 0 }
 0x53d   : > { %v1070_v46 = vand.u32 %v1062_v40, %v2860_v17  ;;  %v2664_v40 = vld [vmem:[%s3123_s3 + $0x20] sm:$0xff]  }
 0x53e   : > { %v1061_v43 = vpack.c.bf16 %v949_v42, %v946_v41 }
 0x540   : > { %2516 = vmatprep.subr.bf16.mxu0 %v1061_v43 }
 0x541   : > { %2517 = vmatpush3.bf16.msra.mxu0 %v1061_v43  ;;  %2533 = vmatmul.mubr.msk.bf16.vlgmr.msra.gmra.mrb[16].mxu1 %vm574_vm2, %v738_v44 }
 0x542   : > { %2518 = vmatprep.subr.bf16.mxu0 %v1070_v46  ;;  %2545 = vmatpush3.bf16.msra.mxu1 %v2662_v34 }
 0x543   : > { %2548 = vmatprep.mubr.msk.bf16.mxu1 %vm285_vm0, %v2830_v50  ;;  %2546 = vmatprep.subr.bf16.mxu1 %v2663_v45 }
 0x545   : > { %2519 = vmatpush3.bf16.msra.mxu0 %v1070_v46 }
 0x546   : > { %2547 = vmatpush3.bf16.msra.mxu1 %v2663_v45  ;;  %2632 = vmatprep.subr.msk.bf16.mxu0 %vm1130_vm6, %v2270_v27 }
 0x549   : > { %2549 = vmatmul.mubr.msk.bf16.vlgmr.msra.gmra.mrb[20].mxu1 %vm285_vm0, %v2828_v49 }
 0x60c   : > { %v2514_v47 = vpop.f32.mrb[12].mxu1 }
 0x60d   : > { %v1009_v48 = vpop.f32.mrb[13].mxu1  ;;  %v1025_v54 = vmul.f32 0.35355338, %v2514_v47  ;;  %v2665_v47 = vld [vmem:[%s3123_s3 + $0x28] sm:$0xff]  }
 0x60e   : > { %v1023_v51 = vmul.f32 0.35355338, %v1009_v48  ;;  %v2515_v52 = vpop.f32.mrb[14].mxu1  ;;  %v2666_v48 = vld [vmem:[%s3123_s3 + $0xa0] sm:$0xff]  }
 0x60f   : > { %v1012_v53 = vpop.f32.mrb[15].mxu1  ;;  %v1032_v59 = vsel %vm645_vm5, %v1025_v54, -inf  ;;  %v2668_v52 = vld [vmem:[%s3123_s3 + $0x30] sm:$0xff]  }
 0x610   : > { %v1024_v55 = vmul.f32 0.35355338, %v1012_v53  ;;  %v1026_v56 = vsel %vm638_vm4, %v1023_v51, -inf }
 0x611   : > { %1027 = vmax.xlane.f32.xlu0 %v1026_v56 }
 0x612   : > { %v1029_v57 = vsel %vm638_vm4, %v1024_v55, -inf }
 0x613   : > { %1030 = vmax.xlane.f32.xlu1 %v1029_v57 }
 0x614   : > { %v2938_v58 = vpop.f32.mrb[16].mxu1 }
 0x615   : > { %1033 = vmax.xlane.f32.xlu0 %v1032_v59  ;;  %v2941_v60 = vpop.f32.mrb[17].mxu1 }
 0x616   : > { %v2535_v61 = vpop.f32.mrb[18].mxu1 }
 0x617   : > { %v2943_v62 = vpop.f32.mrb[19].mxu1 }
 0x61c   : > { %v2550_v63 = vpop.f32.mrb[20].mxu1 }
 0x61d   : > { %v1371_v1 = vpop.f32.mrb[21].mxu1  ;;  %v1380_v4 = vadd.f32 %v2550_v63, %v2290_v0 }
 0x61e   : > { %v2551_v2 = vpop.f32.mrb[22].mxu1  ;;  %v1372_v5 = vadd.f32 %v2290_v0, %v1371_v1 }
 0x61f   : > { %v1374_v3 = vpop.f32.mrb[23].mxu1  ;;  %v1461_v8 = vpack.c.bf16 %v1380_v4, %v1380_v4 }
 0x620   : > { %v1375_v6 = vadd.f32 %v2290_v0, %v1374_v3  ;;  %v2280_v0 = vld [vmem:[%s3124_s4 + $0x2] ss:$0 sm:$0xff] }
 0x621   : > { %v1472_v10 = vsel %vm574_vm2, %v1461_v8, 0 }
 0x622   : > { %v1460_v7 = vpack.c.bf16 %v1375_v6, %v1372_v5 }
 0x624   : > { %2634 = vmatprep.subr.msk.bf16.mxu1 %vm574_vm2, %v1460_v7  ;;  %v1469_v9 = vsel %vm574_vm2, %v1460_v7, 0 }
 0x625   : > { %2561 = vmatpush3.bf16.xpose.msra.mxu1 %v1469_v9 }
 0x626   : > { %2635 = vmatprep.subr.msk.bf16.mxu1 %vm574_vm2, %v1461_v8 }
 0x62d   : > { %2563 = vmatpush3.bf16.xpose.msra.mxu1 %v1472_v10 }
 0x62e   : > { %2582 = vmatprep.subr.bf16.mxu1 %v2668_v52 }
 0x69e   : > { %v1028_v11 = vpop.xlane.xlu0 %1027 }
 0x69f   : > { %v1035_v12 = vsub.f32 %v1023_v51, %v1028_v11  ;;  %v2667_v51 = vld [vmem:[%s3123_s3 + $0xa8] sm:$0xff]  }
 0x6a0   : > { %v1031_v13 = vpop.xlane.xlu1 %1030 }
 0x6a1   : > { %v1038_v14 = vmul.f32 1.442695, %v1035_v12  ;;  %v1036_v15 = vsub.f32 %v1024_v55, %v1031_v13  ;;  %v2670_v13 = vld [vmem:[%s3123_s3 + $0xb0] sm:$0xff]  }
 0x6a2   : > { %v1034_v16 = vpop.xlane.xlu0 %1033 }
 0x6a3   : > { %2692 = vpow2.f32 %v1038_v14  ;;  %v1040_v18 = vmul.f32 1.442695, %v1036_v15  ;;  %v1037_v19 = vsub.f32 %v1025_v54, %v1034_v16 }
 0x6a5   : > { %2694 = vpow2.f32 %v1040_v18  ;;  %v1042_v20 = vmul.f32 1.442695, %v1037_v19  ;;  %v2671_v19 = vld [vmem:[%s3123_s3 + $0xb8] sm:$0xff]  }
 0x6a7   : > { %2696 = vpow2.f32 %v1042_v20 }
 0x6ad   : > { %v2693_v21 = vpop.eup %2692 }
 0x6ae   : > { %v1044_v22 = vsel %vm638_vm4, %v2693_v21, 0.0 }
 0x6af   : > { %v2695_v23 = vpop.eup %2694  ;;  %1045 = vadd.xlane.f32.xlu1 %v1044_v22 }
 0x6b0   : > { %v1047_v24 = vsel %vm638_vm4, %v2695_v23, 0.0 }
 0x6b1   : > { %v2697_v25 = vpop.eup %2696  ;;  %1048 = vadd.xlane.f32.xlu0 %v1047_v24 }
 0x6b2   : > { %v1050_v26 = vsel %vm645_vm5, %v2697_v25, 0.0 }
 0x6b3   : > { %1051 = vadd.xlane.f32.xlu1 %v1050_v26 }
 0x73c   : > { %v1046_v28 = vpop.xlane.xlu1 %1045 }
 0x73d   : > { %2698 = vrcp.f32 %v1046_v28 }
 0x73e   : > { %v1049_v29 = vpop.xlane.xlu0 %1048 }
 0x73f   : > { %2700 = vrcp.f32 %v1049_v29 }
 0x740   : > { %v1052_v30 = vpop.xlane.xlu1 %1051 }
 0x741   : > { %2702 = vrcp.f32 %v1052_v30  ;;  %v2317_v30 = vld [vmem:[%s3124_s4 + $0x3] ss:$0 sm:$0xff] }
 0x747   : > { %v2699_v31 = vpop.eup %2698 }
 0x748   : > { %v1056_v33 = vmul.f32 %v2699_v31, %v2693_v21 }
 0x749   : > { %v2701_v32 = vpop.eup %2700 }
 0x74a   : > { %v1057_v34 = vmul.f32 %v2701_v32, %v2695_v23 }
 0x74b   : > { %v2703_v35 = vpop.eup %2702 }
 0x74c   : > { %v1058_v36 = vmul.f32 %v2703_v35, %v2697_v25  ;;  %v1059_v37 = vpack.c.bf16 %v1057_v34, %v1056_v33 }
 0x74e   : > { %2520 = vmatprep.mubr.msk.bf16.mxu0 %vm638_vm4, %v1059_v37  ;;  %v1060_v38 = vpack.c.bf16 %v1058_v36, %v1058_v36 }
 0x750   : > { %2521 = vmatmul.mubr.msk.bf16.vlgmr.msra.gmra.mrb[20].mxu0 %vm638_vm4, %v1060_v38 }
 0x751   : > { %2525 = vmatpush3.bf16.msra.mxu0 %v1132_v39 }
 0x752   : > { %2536 = vmatprep.subr.bf16.mxu0 %v2664_v40 }
 0x823   : > { %v2522_v41 = vpop.f32.mrb[20].mxu0 }
 0x824   : > { %v1106_v42 = vpop.f32.mrb[21].mxu0  ;;  %v1121_v46 = vpack.c.bf16 %v2522_v41, %v2522_v41 }
 0x825   : > { %v2523_v43 = vpop.f32.mrb[22].mxu0 }
 0x826   : > { %v1109_v44 = vpop.f32.mrb[23].mxu0 }
 0x827   : > { %v1120_v45 = vpack.c.bf16 %v1109_v44, %v1106_v42 }
 0x829   : > { %2526 = vmatprep.mubr.msk.bf16.mxu0 %vm574_vm2, %v1120_v45 }
 0x82a   : > { %2527 = vmatmul.mubr.msk.bf16.vlgmr.msra.gmra.mrb[24].mxu0 %vm574_vm2, %v1121_v46 }
 0x82b   : > { %2537 = vmatpush3.bf16.msra.mxu0 %v2664_v40  ;;  %2540 = vmatprep.mubr.msk.bf16.mxu0 %vm285_vm0, %v2830_v50  ;;  %v2337_v40 = vld [vmem:[%s3124_s4 + $0xb] ss:$0 sm:$0xff] }
 0x82c   : > { %2538 = vmatprep.subr.bf16.mxu0 %v2665_v47 }
 0x82f   : > { %2539 = vmatpush3.bf16.msra.mxu0 %v2665_v47 }
 0x830   : > { %2552 = vmatprep.subr.bf16.mxu0 %v2666_v48 }
 0x832   : > { %2541 = vmatmul.mubr.msk.bf16.vlgmr.msra.gmra.mrb[28].mxu0 %vm285_vm0, %v2828_v49 }
 0x833   : > { %2553 = vmatpush3.bf16.msra.mxu0 %v2666_v48  ;;  %2556 = vmatprep.mubr.msk.bf16.mxu0 %vm285_vm0, %v2830_v50 }
 0x834   : > { %2554 = vmatprep.subr.bf16.mxu0 %v2667_v51 }
 0x837   : > { %2555 = vmatpush3.bf16.msra.mxu0 %v2667_v51 }
 0x83a   : > { %2557 = vmatmul.mubr.msk.bf16.vlgmr.msra.gmra.mrb[32].mxu0 %vm285_vm0, %v2828_v49 }
 0x8fd   : > { %v2528_v53 = vpop.f32.mrb[24].mxu0 }
 0x8fe   : > { %v2988_v54 = vadd.f32 %v2938_v58, %v2528_v53  ;;  %v1168_v55 = vpop.f32.mrb[25].mxu0 }
 0x8ff   : > { %v2991_v56 = vadd.f32 %v2941_v60, %v1168_v55  ;;  %v2529_v57 = vpop.f32.mrb[26].mxu0  ;;  %v2300_v60 = vld [vmem:[%s3124_s4 + $0xa] ss:$0 sm:$0xff] }
 0x900   : > { %v1171_v59 = vpop.f32.mrb[27].mxu0 }
 0x901   : > { %v2994_v61 = vadd.f32 %v2943_v62, %v1171_v59  ;;  %v2669_v62 = vld [vmem:[%s3123_s3 + $0x38] sm:$0xff]  }
 0x905   : > { %v2542_v63 = vpop.f32.mrb[28].mxu0 }
 0x906   : > { %v1298_v1 = vpop.f32.mrb[29].mxu0  ;;  %v1307_v3 = vadd.f32 %v2542_v63, %v2280_v0 }
 0x907   : > { %v2543_v2 = vpop.f32.mrb[30].mxu0  ;;  %v1299_v58 = vadd.f32 %v2280_v0, %v1298_v1 }
 0x908   : > { %v1301_v4 = vpop.f32.mrb[31].mxu0  ;;  %v1459_v7 = vpack.c.bf16 %v1307_v3, %v1307_v3 }
 0x909   : > { %v1302_v5 = vadd.f32 %v2280_v0, %v1301_v4 }
 0x90b   : > { %v1458_v6 = vpack.c.bf16 %v1302_v5, %v1299_v58 }
 0x90d   : > { %v2558_v8 = vpop.f32.mrb[32].mxu0  ;;  %2564 = vmatprep.mubr.msk.bf16.mxu1 %vm574_vm2, %v1458_v6 }
 0x90e   : > { %v1453_v9 = vadd.f32 %v2558_v8, %v2300_v60  ;;  %v1444_v10 = vpop.f32.mrb[33].mxu0  ;;  %2565 = vmatmul.mubr.msk.bf16.vlgmr.msra.gmra.mrb[24].mxu1 %vm574_vm2, %v1459_v7  ;;  %v2309_v7 = vld [vmem:[%s3125_s5 + $0x8] sm:$0xf] }
 0x90f   : > { %v2559_v11 = vpop.f32.mrb[34].mxu0  ;;  %2583 = vmatpush3.bf16.msra.mxu1 %v2668_v52  ;;  %2586 = vmatprep.mubr.msk.bf16.mxu1 %vm285_vm0, %v2830_v50  ;;  %v1445_v15 = vadd.f32 %v2300_v60, %v1444_v10 }
 0x910   : > { %v1447_v12 = vpop.f32.mrb[35].mxu0  ;;  %2584 = vmatprep.subr.bf16.mxu1 %v2669_v62  ;;  %v1561_v14 = vpack.c.bf16 %v1453_v9, %v1453_v9 }
 0x911   : > { %v1448_v16 = vadd.f32 %v2300_v60, %v1447_v12 }
 0x912   : > { %v1569_v20 = vand.u32 %v1561_v14, %v2860_v17 }
 0x913   : > { %v1560_v18 = vpack.c.bf16 %v1448_v16, %v1445_v15  ;;  %2585 = vmatpush3.bf16.msra.mxu1 %v2669_v62 }
 0x914   : > { %2598 = vmatprep.subr.bf16.mxu1 %v2670_v13 }
 0x915   : > { %2568 = vmatprep.subr.bf16.mxu0 %v1560_v18 }
 0x916   : > { %2569 = vmatpush3.bf16.msra.mxu0 %v1560_v18  ;;  %2587 = vmatmul.mubr.msk.bf16.vlgmr.msra.gmra.mrb[28].mxu1 %vm285_vm0, %v2828_v49 }
 0x917   : > { %2570 = vmatprep.subr.bf16.mxu0 %v1569_v20  ;;  %2599 = vmatpush3.bf16.msra.mxu1 %v2670_v13 }
 0x918   : > { %2602 = vmatprep.mubr.msk.bf16.mxu1 %vm285_vm0, %v2830_v50  ;;  %2600 = vmatprep.subr.bf16.mxu1 %v2671_v19 }
 0x91a   : > { %2571 = vmatpush3.bf16.msra.mxu0 %v1569_v20  ;;  %v2672_v20 = vld [vmem:[%s3123_s3 + $0x70] sm:$0xff]  }
 0x91b   : > { %2601 = vmatpush3.bf16.msra.mxu1 %v2671_v19  ;;  %2636 = vmatprep.subr.msk.bf16.mxu0 %vm1130_vm6, %v2309_v7  ;;  %v1630_v19 = vsel %vm1130_vm6, %v2309_v7, 0 }
 0x91e   : > { %2603 = vmatmul.mubr.msk.bf16.vlgmr.msra.gmra.mrb[32].mxu1 %vm285_vm0, %v2828_v49 }
 0x9e1   : > { %v2566_v21 = vpop.f32.mrb[24].mxu1 }
 0x9e2   : > { %v1508_v22 = vpop.f32.mrb[25].mxu1  ;;  %v1524_v26 = vmul.f32 0.35355338, %v2566_v21 }
 0x9e3   : > { %v1522_v23 = vmul.f32 0.35355338, %v1508_v22  ;;  %v2567_v24 = vpop.f32.mrb[26].mxu1 }
 0x9e4   : > { %v1511_v25 = vpop.f32.mrb[27].mxu1  ;;  %v1531_v32 = vsel %vm645_vm5, %v1524_v26, -inf }
 0x9e5   : > { %v1523_v27 = vmul.f32 0.35355338, %v1511_v25  ;;  %v1525_v28 = vsel %vm638_vm4, %v1522_v23, -inf }
 0x9e6   : > { %1526 = vmax.xlane.f32.xlu0 %v1525_v28 }
 0x9e7   : > { %v1528_v29 = vsel %vm638_vm4, %v1523_v27, -inf }
 0x9e8   : > { %1529 = vmax.xlane.f32.xlu1 %v1528_v29 }
 0x9e9   : > { %v2588_v31 = vpop.f32.mrb[28].mxu1 }
 0x9ea   : > { %v3028_v33 = vadd.f32 %v2588_v31, %v2317_v30  ;;  %1532 = vmax.xlane.f32.xlu0 %v1531_v32  ;;  %v1742_v34 = vpop.f32.mrb[29].mxu1 }
 0x9eb   : > { %v2589_v35 = vpop.f32.mrb[30].mxu1  ;;  %v3030_v37 = vadd.f32 %v2317_v30, %v1742_v34 }
 0x9ec   : > { %v1745_v36 = vpop.f32.mrb[31].mxu1 }
 0x9ed   : > { %v3032_v38 = vadd.f32 %v2317_v30, %v1745_v36 }
 0x9ef   : > { %v1902_v39 = vpack.c.bf16 %v3032_v38, %v3030_v37 }
 0x9f1   : > { %v2604_v41 = vpop.f32.mrb[32].mxu1 }
 0x9f2   : > { %v1897_v42 = vadd.f32 %v2604_v41, %v2337_v40  ;;  %v1888_v43 = vpop.f32.mrb[33].mxu1 }
 0x9f3   : > { %v2605_v44 = vpop.f32.mrb[34].mxu1  ;;  %v1889_v47 = vadd.f32 %v2337_v40, %v1888_v43  ;;  %v1903_v43 = vpack.c.bf16 %v3028_v33, %v3028_v33 }
 0x9f4   : > { %v1891_v45 = vpop.f32.mrb[35].mxu1  ;;  %v2005_v46 = vpack.c.bf16 %v1897_v42, %v1897_v42 }
 0x9f5   : > { %v1892_v48 = vadd.f32 %v2337_v40, %v1891_v45 }
 0x9f6   : > { %v2013_v52 = vand.u32 %v2005_v46, %v2860_v17 }
 0x9f7   : > { %v2004_v51 = vpack.c.bf16 %v1892_v48, %v1889_v47 }
 0x9f9   : > { %2614 = vmatprep.subr.bf16.mxu1 %v2004_v51 }
 0x9fa   : > { %2615 = vmatpush3.bf16.msra.mxu1 %v2004_v51 }
 0x9fb   : > { %2616 = vmatprep.subr.bf16.mxu1 %v2013_v52 }
 0x9fe   : > { %2617 = vmatpush3.bf16.msra.mxu1 %v2013_v52 }
 0xa73   : > { %v1527_v53 = vpop.xlane.xlu0 %1526 }
 0xa74   : > { %v1534_v55 = vsub.f32 %v1522_v23, %v1527_v53 }
 0xa75   : > { %v1530_v57 = vpop.xlane.xlu1 %1529 }
 0xa76   : > { %v1537_v59 = vmul.f32 1.442695, %v1534_v55  ;;  %v1535_v63 = vsub.f32 %v1523_v27, %v1530_v57  ;;  %v2673_v27 = vld [vmem:[%s3123_s3 + $0x78] sm:$0xff]  }
 0xa77   : > { %v1533_v0 = vpop.xlane.xlu0 %1532 }
 0xa78   : > { %2704 = vpow2.f32 %v1537_v59  ;;  %v1539_v1 = vmul.f32 1.442695, %v1535_v63  ;;  %v1536_v2 = vsub.f32 %v1524_v26, %v1533_v0 }
 0xa7a   : > { %2706 = vpow2.f32 %v1539_v1  ;;  %v1541_v3 = vmul.f32 1.442695, %v1536_v2 }
 0xa7c   : > { %2708 = vpow2.f32 %v1541_v3 }
 0xa82   : > { %v2705_v4 = vpop.eup %2704 }
 0xa83   : > { %v1543_v58 = vsel %vm638_vm4, %v2705_v4, 0.0 }
 0xa84   : > { %v2707_v17 = vpop.eup %2706  ;;  %1544 = vadd.xlane.f32.xlu1 %v1543_v58 }
 0xa85   : > { %v1546_v5 = vsel %vm638_vm4, %v2707_v17, 0.0 }
 0xa86   : > { %v2709_v6 = vpop.eup %2708  ;;  %1547 = vadd.xlane.f32.xlu0 %v1546_v5 }
 0xa87   : > { %v1549_v60 = vsel %vm645_vm5, %v2709_v6, 0.0 }
 0xa88   : > { %1550 = vadd.xlane.f32.xlu1 %v1549_v60 }
 0xb11   : > { %v1545_v62 = vpop.xlane.xlu1 %1544 }
 0xb12   : > { %2710 = vrcp.f32 %v1545_v62 }
 0xb13   : > { %v1548_v8 = vpop.xlane.xlu0 %1547 }
 0xb14   : > { %2712 = vrcp.f32 %v1548_v8  ;;  %v2346_v8 = vld [vmem:[%s3125_s5 + $0xc] sm:$0xf] }
 0xb15   : > { %v1551_v9 = vpop.xlane.xlu1 %1550  ;;  %2639 = vmatprep.subr.msk.bf16.mxu1 %vm1130_vm6, %v2346_v8 }
 0xb16   : > { %2714 = vrcp.f32 %v1551_v9 }
 0xb1c   : > { %v2711_v10 = vpop.eup %2710 }
 0xb1d   : > { %v1555_v12 = vmul.f32 %v2711_v10, %v2705_v4 }
 0xb1e   : > { %v2713_v11 = vpop.eup %2712 }
 0xb1f   : > { %v1556_v13 = vmul.f32 %v2713_v11, %v2707_v17 }
 0xb20   : > { %v2715_v14 = vpop.eup %2714 }
 0xb21   : > { %v1557_v15 = vmul.f32 %v2715_v14, %v2709_v6  ;;  %v1558_v16 = vpack.c.bf16 %v1556_v13, %v1555_v12 }
 0xb23   : > { %2572 = vmatprep.mubr.msk.bf16.mxu0 %vm638_vm4, %v1558_v16  ;;  %v1559_v18 = vpack.c.bf16 %v1557_v15, %v1557_v15 }
 0xb25   : > { %2573 = vmatmul.mubr.msk.bf16.vlgmr.msra.gmra.mrb[36].mxu0 %vm638_vm4, %v1559_v18 }
 0xb26   : > { %2577 = vmatpush3.bf16.msra.mxu0 %v1630_v19 }
 0xb27   : > { %2590 = vmatprep.subr.bf16.mxu0 %v2672_v20 }
 0xbf8   : > { %v2574_v21 = vpop.f32.mrb[36].mxu0 }
 0xbf9   : > { %v1605_v22 = vpop.f32.mrb[37].mxu0  ;;  %v1620_v26 = vpack.c.bf16 %v2574_v21, %v2574_v21  ;;  %v2074_v21 = vsel %vm1130_vm6, %v2346_v8, 0 }
 0xbfa   : > { %v2575_v23 = vpop.f32.mrb[38].mxu0 }
 0xbfb   : > { %v1608_v24 = vpop.f32.mrb[39].mxu0 }
 0xbfc   : > { %v1619_v25 = vpack.c.bf16 %v1608_v24, %v1605_v22 }
 0xbfe   : > { %2578 = vmatprep.mubr.msk.bf16.mxu0 %vm574_vm2, %v1619_v25 }
 0xbff   : > { %2579 = vmatmul.mubr.msk.bf16.vlgmr.msra.gmra.mrb[40].mxu0 %vm574_vm2, %v1620_v26 }
 0xc00   : > { %2591 = vmatpush3.bf16.msra.mxu0 %v2672_v20  ;;  %2594 = vmatprep.mubr.msk.bf16.mxu0 %vm285_vm0, %v2830_v50 }
 0xc01   : > { %2592 = vmatprep.subr.bf16.mxu0 %v2673_v27 }
 0xc04   : > { %2593 = vmatpush3.bf16.msra.mxu0 %v2673_v27 }
 0xc07   : > { %2595 = vmatmul.mubr.msk.bf16.vlgmr.msra.gmra.mrb[44].mxu0 %vm285_vm0, %v2828_v49  ;;  %v2327_v49 = vld [vmem:[%s3124_s4 + $0x7] ss:$0 sm:$0xff] }
 0xc08   : > { %2610 = vmatprep.mubr.msk.bf16.mxu0 %vm574_vm2, %v1902_v39 }
 0xcd2   : > { %v2580_v28 = vpop.f32.mrb[40].mxu0 }
 0xcd3   : > { %v3067_v29 = vadd.f32 %v2580_v28, %v2988_v54  ;;  %v1666_v30 = vpop.f32.mrb[41].mxu0 }
 0xcd4   : > { %v3070_v31 = vadd.f32 %v1666_v30, %v2991_v56  ;;  %v2581_v32 = vpop.f32.mrb[42].mxu0 }
 0xcd5   : > { %v1669_v50 = vpop.f32.mrb[43].mxu0 }
 0xcd6   : > { %v3073_v34 = vadd.f32 %v1669_v50, %v2994_v61  ;;  %v2349_v50 = vld [vmem:[%s3126_s6] ss:$0 sm:$0xff] }
 0xcda   : > { %v2596_v35 = vpop.f32.mrb[44].mxu0 }
 0xcdb   : > { %v1815_v36 = vpop.f32.mrb[45].mxu0  ;;  %v1824_v39 = vadd.f32 %v2596_v35, %v2327_v49 }
 0xcdc   : > { %v2597_v37 = vpop.f32.mrb[46].mxu0  ;;  %v1816_v54 = vadd.f32 %v2327_v49, %v1815_v36  ;;  %v2728_v36 = vld [vmem:[%s2796_s29 + $0x10] sm:$0x1] }
 0xcdd   : > { %v1818_v38 = vpop.f32.mrb[47].mxu0  ;;  %v1905_v42 = vpack.c.bf16 %v1824_v39, %v1824_v39  ;;  %v2729_v39 = vld [vmem:[%s2796_s29] sm:$0xff] }
 0xcde   : > { %v1819_v40 = vadd.f32 %v2327_v49, %v1818_v38 }
 0xcdf   : > { %v1916_v61 = vsel %vm574_vm2, %v1905_v42, 0 }
 0xce0   : > { %v1904_v41 = vpack.c.bf16 %v1819_v40, %v1816_v54 }
 0xce2   : > { %2637 = vmatprep.subr.msk.bf16.mxu0 %vm574_vm2, %v1904_v41  ;;  %v1913_v56 = vsel %vm574_vm2, %v1904_v41, 0 }
 0xce3   : > { %2607 = vmatpush3.bf16.xpose.msra.mxu0 %v1913_v56 }
 0xce4   : > { %2638 = vmatprep.subr.msk.bf16.mxu0 %vm574_vm2, %v1905_v42  ;;  %v2730_v42 = vld [vmem:[%s2796_s29 + $0x8] sm:$0xff] }
 0xceb   : > { %2609 = vmatpush3.bf16.xpose.msra.mxu0 %v1916_v61 }
 0xcf2   : > { %2611 = vmatmul.mubr.msk.bf16.vlgmr.msra.gmra.mrb[48].mxu0 %vm574_vm2, %v1903_v43 }
 0xdc5   : > { %v2612_v44 = vpop.f32.mrb[48].mxu0 }
 0xdc6   : > { %v1952_v45 = vpop.f32.mrb[49].mxu0  ;;  %v1968_v51 = vmul.f32 0.35355338, %v2612_v44 }
 0xdc7   : > { %v1966_v46 = vmul.f32 0.35355338, %v1952_v45  ;;  %v2613_v47 = vpop.f32.mrb[50].mxu0 }
 0xdc8   : > { %v1955_v48 = vpop.f32.mrb[51].mxu0  ;;  %v1975_v57 = vsel %vm645_vm5, %v1968_v51, -inf }
 0xdc9   : > { %v1967_v52 = vmul.f32 0.35355338, %v1955_v48  ;;  %v1969_v53 = vsel %vm638_vm4, %v1966_v46, -inf }
 0xdca   : > { %1970 = vmax.xlane.f32.xlu0 %v1969_v53 }
 0xdcb   : > { %v1972_v55 = vsel %vm638_vm4, %v1967_v52, -inf }
 0xdcc   : > { %1973 = vmax.xlane.f32.xlu1 %v1972_v55 }
 0xdce   : > { %1976 = vmax.xlane.f32.xlu0 %v1975_v57 }
 0xe57   : > { %v1971_v59 = vpop.xlane.xlu0 %1970 }
 0xe58   : > { %v1978_v33 = vsub.f32 %v1966_v46, %v1971_v59 }
 0xe59   : > { %v1974_v63 = vpop.xlane.xlu1 %1973 }
 0xe5a   : > { %v1981_v0 = vmul.f32 1.442695, %v1978_v33  ;;  %v1979_v1 = vsub.f32 %v1967_v52, %v1974_v63 }
 0xe5b   : > { %v1977_v2 = vpop.xlane.xlu0 %1976 }
 0xe5c   : > { %2716 = vpow2.f32 %v1981_v0  ;;  %v1983_v3 = vmul.f32 1.442695, %v1979_v1  ;;  %v1980_v4 = vsub.f32 %v1968_v51, %v1977_v2 }
 0xe5e   : > { %2718 = vpow2.f32 %v1983_v3  ;;  %v1985_v58 = vmul.f32 1.442695, %v1980_v4 }
 0xe60   : > { %2720 = vpow2.f32 %v1985_v58 }
 0xe66   : > { %v2717_v17 = vpop.eup %2716 }
 0xe67   : > { %v1987_v5 = vsel %vm638_vm4, %v2717_v17, 0.0 }
 0xe68   : > { %v2719_v6 = vpop.eup %2718  ;;  %1988 = vadd.xlane.f32.xlu1 %v1987_v5 }
 0xe69   : > { %v1990_v60 = vsel %vm638_vm4, %v2719_v6, 0.0 }
 0xe6a   : > { %v2721_v7 = vpop.eup %2720  ;;  %1991 = vadd.xlane.f32.xlu0 %v1990_v60 }
 0xe6b   : > { %v1993_v62 = vsel %vm645_vm5, %v2721_v7, 0.0 }
 0xe6c   : > { %1994 = vadd.xlane.f32.xlu1 %v1993_v62 }
 0xef5   : > { %v1989_v9 = vpop.xlane.xlu1 %1988 }
 0xef6   : > { %2722 = vrcp.f32 %v1989_v9 }
 0xef7   : > { %v1992_v10 = vpop.xlane.xlu0 %1991 }
 0xef8   : > { %2724 = vrcp.f32 %v1992_v10 }
 0xef9   : > { %v1995_v11 = vpop.xlane.xlu1 %1994 }
 0xefa   : > { %2726 = vrcp.f32 %v1995_v11 }
 0xf00   : > { %v2723_v12 = vpop.eup %2722 }
 0xf01   : > { %v1999_v14 = vmul.f32 %v2723_v12, %v2717_v17 }
 0xf02   : > { %v2725_v13 = vpop.eup %2724 }
 0xf03   : > { %v2000_v15 = vmul.f32 %v2725_v13, %v2719_v6 }
 0xf04   : > { %v2727_v16 = vpop.eup %2726 }
 0xf05   : > { %v2001_v18 = vmul.f32 %v2727_v16, %v2721_v7  ;;  %v2002_v19 = vpack.c.bf16 %v2000_v15, %v1999_v14 }
 0xf07   : > { %v2003_v20 = vpack.c.bf16 %v2001_v18, %v2001_v18  ;;  %2618 = vmatprep.mubr.msk.bf16.mxu1 %vm638_vm4, %v2002_v19 }
 0xf09   : > { %2619 = vmatmul.mubr.msk.bf16.vlgmr.msra.gmra.mrb[36].mxu1 %vm638_vm4, %v2003_v20 }
 0xf0a   : > { %2623 = vmatpush3.bf16.msra.mxu1 %v2074_v21 }
 0xfdc   : > { %v2620_v22 = vpop.f32.mrb[36].mxu1 }
 0xfdd   : > { %v2049_v23 = vpop.f32.mrb[37].mxu1  ;;  %v2064_v27 = vpack.c.bf16 %v2620_v22, %v2620_v22 }
 0xfde   : > { %v2621_v24 = vpop.f32.mrb[38].mxu1 }
 0xfdf   : > { %v2052_v25 = vpop.f32.mrb[39].mxu1 }
 0xfe0   : > { %v2063_v26 = vpack.c.bf16 %v2052_v25, %v2049_v23 }
 0xfe2   : > { %2624 = vmatprep.mubr.msk.bf16.mxu1 %vm574_vm2, %v2063_v26 }
 0xfe3   : > { %2625 = vmatmul.mubr.msk.bf16.vlgmr.msra.gmra.mrb[40].mxu1 %vm574_vm2, %v2064_v27 }
0x10b6   : > { %v2626_v28 = vpop.f32.mrb[40].mxu1 }
0x10b7   : > { %v2126_v30 = vadd.f32 %v2626_v28, %v3067_v29  ;;  %v2110_v32 = vpop.f32.mrb[41].mxu1 }
0x10b8   : > { %v2124_v35 = vadd.f32 %v2110_v32, %v3070_v31  ;;  %v2627_v49 = vpop.f32.mrb[42].mxu1 }
0x10b9   : > { %v2129_v37 = vadd.f32 %v2728_v36, %v2126_v30  ;;  %v2113_v38 = vpop.f32.mrb[43].mxu1 }
0x10ba   : > { %v2127_v54 = vadd.f32 %v2729_v39, %v2124_v35  ;;  %v2125_v29 = vadd.f32 %v2113_v38, %v3073_v34 }
0x10bb   : > { %v2139_v40 = vadd.f32 %v2349_v50, %v2129_v37 }
0x10bc   : > { %v2137_v41 = vadd.f32 %v2349_v50, %v2127_v54  ;;  %v2128_v56 = vadd.f32 %v2730_v42, %v2125_v29 }
0x10bd   : > { %2142 = vst.msk [vmem:[%s278_s19 + $0x10] sm:$0x1] %vm292_vm1, %v2139_v40 }
0x10be   : > { %2140 = vst.msk [vmem:[%s278_s19] sm:$0xff] %vm285_vm0, %v2137_v41  ;;  %v2138_v31 = vadd.f32 %v2349_v50, %v2128_v56 }
0x10c0   : > { %2141 = vst.msk [vmem:[%s278_s19 + $0x8] sm:$0xff] %vm285_vm0, %v2138_v31 }
0x10c1 PF: > { %s17_s24 = sadd.s32 1, %s2737_s24  }
0x10c2   : > { %p14_p4 = scmp.ge.s32.totalorder %s17_s24, 4  }
0x10c4   :  { %16 = sbr.rel (!%p14_p4) target bundleno = 1 (0x1), region = 103 }

</bundles_post_ra>
